<compile_context>
chip_gen: v5e
topology: v5e:2x2
jax: 0.10.0
libtpu: 0.0.40
codegen_flags: <defaults>
</compile_context>

<pallas_src>
import functools

import jax
import jax.numpy as jnp
from jax.experimental import pallas as pl
from jax.experimental.pallas import tpu as pltpu

# Logical (PyTorch) dims.
IN_DIM = 28 * 28   # 784  (multiple of 8; kept unpadded -> less x DMA traffic)
H1 = 400
H2 = 200
OUT_DIM = 10

# Padded (TPU-friendly) feature dims for weights / activations.
H1_PAD = 512
H2_PAD = 256
OUT_PAD = 128      # lane-dense output -> unmasked vst


def _round_up(n, m):
    return ((n + m - 1) // m) * m


def _pad2d(a, rows, cols):
    r, c = a.shape
    return jnp.pad(a, ((0, rows - r), (0, cols - c)))


def _choose_tile(B, batch_tile):
    """Pick the batch tile.

    - Tiny batches: one grid step, minimal (sublane-aligned) padding.
    - Large batches: 256-multiple tiles (full-width MXU M-passes on v6e/v7x,
      still a 128-multiple for v5e), capped at ceil(B/2) rounded up so the
      grid always has >= 2 steps to shard across v7x's two TensorCores.
    """
    B8 = _round_up(B, 8)
    if B8 <= 256:
        return B8
    tb = min(_round_up(batch_tile, 256), _round_up(pl.cdiv(B, 2), 256))
    return max(tb, 256)


def _mlp_kernel(x_ref, w1_ref, b1_ref, w2_ref, b2_ref, w3_ref, b3_ref, o_ref):
    # Whole padded MLP for one batch tile, entirely in VMEM.
    # MXU operands are bf16; accumulation, bias-add and ReLU are f32.
    x = x_ref[...]                                                     # (tb, 784) bf16
    h1 = jnp.dot(x, w1_ref[...], preferred_element_type=jnp.float32) + b1_ref[...]
    h1 = jnp.maximum(h1, 0.0).astype(jnp.bfloat16)                     # (tb, H1_PAD)
    h2 = jnp.dot(h1, w2_ref[...], preferred_element_type=jnp.float32) + b2_ref[...]
    h2 = jnp.maximum(h2, 0.0).astype(jnp.bfloat16)                     # (tb, H2_PAD)
    out = jnp.dot(h2, w3_ref[...], preferred_element_type=jnp.float32) + b3_ref[...]
    o_ref[...] = out.astype(o_ref.dtype)                               # (tb, OUT_PAD) bf16


def prepare_params(params):
    """One-time padding + casting of the PyTorch-layout params.

    Input: w1 (784,400), b1 (1,400), w2 (400,200), b2 (1,200),
           w3 (200,10),  b3 (1,10)   (weights already (in, out)).
    Output: zero-padded, bf16 weights / f32 biases ready for the kernel.
    Hoisted out of the forward so the pads/casts don't re-run every call.
    """
    f32 = jnp.float32
    return {
        "w1": _pad2d(jnp.asarray(params["w1"], f32), IN_DIM, H1_PAD).astype(jnp.bfloat16),
        "w2": _pad2d(jnp.asarray(params["w2"], f32), H1_PAD, H2_PAD).astype(jnp.bfloat16),
        "w3": _pad2d(jnp.asarray(params["w3"], f32), H2_PAD, OUT_PAD).astype(jnp.bfloat16),
        "b1": _pad2d(jnp.asarray(params["b1"], f32).reshape(1, -1), 1, H1_PAD),
        "b2": _pad2d(jnp.asarray(params["b2"], f32).reshape(1, -1), 1, H2_PAD),
        "b3": _pad2d(jnp.asarray(params["b3"], f32).reshape(1, -1), 1, OUT_PAD),
    }


@functools.partial(jax.jit, static_argnames=("batch_tile",))
def fully_connected_net(x, prepared, *, batch_tile=512):
    """Forward pass of FullyConnectedNet.

    x: (B, 1, 28, 28) or anything reshapeable to (-1, 784).
    prepared: output of prepare_params().
    Returns (B, 10) float32 logits.
    """
    # Single cast pass, no f32 intermediate, no lane-dim padding.
    x2d = x.reshape(-1, IN_DIM).astype(jnp.bfloat16)
    B = x2d.shape[0]

    tb = _choose_tile(B, batch_tile)
    B_pad = _round_up(B, tb)
    if B_pad != B:                       # only pad the batch when needed
        x2d = jnp.pad(x2d, ((0, B_pad - B), (0, 0)))
    grid = (B_pad // tb,)

    w1, b1 = prepared["w1"], prepared["b1"]
    w2, b2 = prepared["w2"], prepared["b2"]
    w3, b3 = prepared["w3"], prepared["b3"]

    full = lambda i: (0, 0)

    # Explicit VMEM budget: 2x x-tile + 2x out-tile (double-buffered), weights
    # (worst-case double-buffered), f32+bf16 intermediates, f32 pre-store out.
    w_bytes = sum(int(prepared[k].size) * prepared[k].dtype.itemsize
                  for k in ("w1", "w2", "w3", "b1", "b2", "b3"))
    vmem_bytes = (
        2 * tb * IN_DIM * 2
        + 2 * tb * OUT_PAD * 2
        + 2 * w_bytes
        + tb * (H1_PAD + H2_PAD) * (4 + 2)
        + tb * OUT_PAD * 4
    )
    vmem_limit = int(min(max(2 * vmem_bytes + (4 << 20), 16 << 20), 48 << 20))

    flops = 2 * B_pad * (IN_DIM * H1_PAD + H1_PAD * H2_PAD + H2_PAD * OUT_PAD)
    bytes_accessed = int(x2d.size) * 2 + w_bytes + B_pad * OUT_PAD * 2

    out = pl.pallas_call(
        _mlp_kernel,
        out_shape=jax.ShapeDtypeStruct((B_pad, OUT_PAD), jnp.bfloat16),
        grid_spec=pltpu.PrefetchScalarGridSpec(
            num_scalar_prefetch=0,
            grid=grid,
            in_specs=[
                pl.BlockSpec((tb, IN_DIM), lambda i: (i, 0)),   # x tile (last dim = full 784)
                pl.BlockSpec((IN_DIM, H1_PAD), full),           # w1 (constant idx -> DMA'd once)
                pl.BlockSpec((1, H1_PAD), full),                # b1
                pl.BlockSpec((H1_PAD, H2_PAD), full),           # w2
                pl.BlockSpec((1, H2_PAD), full),                # b2
                pl.BlockSpec((H2_PAD, OUT_PAD), full),          # w3
                pl.BlockSpec((1, OUT_PAD), full),               # b3
            ],
            out_specs=pl.BlockSpec((tb, OUT_PAD), lambda i: (i, 0)),
        ),
        compiler_params=pltpu.CompilerParams(
            dimension_semantics=("parallel",),
            vmem_limit_bytes=vmem_limit,
        ),
        cost_estimate=pl.CostEstimate(
            flops=int(flops), transcendentals=0, bytes_accessed=int(bytes_accessed)
        ),
    )(x2d, w1, b1, w2, b2, w3, b3)

    # Strip batch / lane padding; return f32 logits like the original module
    # (upcast of a tiny (B,10) slice is negligible).
    return out[:B, :OUT_DIM].astype(jnp.float32)


def init_params(key):
    """Deterministic init matching nn.Linear (uniform +/- 1/sqrt(fan_in))."""
    ks = jax.random.split(key, 6)

    def linear(kw, kb, fan_in, fan_out):
        bound = 1.0 / (fan_in ** 0.5)
        # PyTorch stores weight as (out, in); we use (in, out) for x @ W.
        w = jax.random.uniform(kw, (fan_in, fan_out), jnp.float32, -bound, bound)
        b = jax.random.uniform(kb, (1, fan_out), jnp.float32, -bound, bound)
        return w, b

    w1, b1 = linear(ks[0], ks[1], IN_DIM, H1)
    w2, b2 = linear(ks[2], ks[3], H1, H2)
    w3, b3 = linear(ks[4], ks[5], H2, OUT_DIM)
    return {"w1": w1, "b1": b1, "w2": w2, "b2": b2, "w3": w3, "b3": b3}


def reference_forward_bf16(x, params):
    """Reference mirroring kernel numerics (bf16 MXU operands, f32 accum, bf16 store)."""
    x2d = x.reshape(-1, IN_DIM).astype(jnp.bfloat16)
    h1 = jnp.dot(x2d, params["w1"].astype(jnp.bfloat16),
                 preferred_element_type=jnp.float32) + params["b1"]
    h1 = jnp.maximum(h1, 0.0).astype(jnp.bfloat16)
    h2 = jnp.dot(h1, params["w2"].astype(jnp.bfloat16),
                 preferred_element_type=jnp.float32) + params["b2"]
    h2 = jnp.maximum(h2, 0.0).astype(jnp.bfloat16)
    out = jnp.dot(h2, params["w3"].astype(jnp.bfloat16),
                  preferred_element_type=jnp.float32) + params["b3"]
    return out.astype(jnp.bfloat16).astype(jnp.float32)


def reference_forward_f32(x, params):
    x2d = x.reshape(-1, IN_DIM).astype(jnp.float32)
    h1 = jnp.maximum(x2d @ params["w1"] + params["b1"], 0.0)
    h2 = jnp.maximum(h1 @ params["w2"] + params["b2"], 0.0)
    return h2 @ params["w3"] + params["b3"]


if __name__ == "__main__":
    key = jax.random.PRNGKey(0)
    kp, kx1, kx2 = jax.random.split(key, 3)

    params = init_params(kp)
    prepared = prepare_params(params)   # pad/cast once, outside the forward

    # Small MNIST-like batch: (B=8, C=1, H=28, W=28), NCHW like PyTorch.
    x_small = jax.random.normal(kx1, (8, 1, 28, 28), jnp.float32)
    out_small = jax.block_until_ready(fully_connected_net(x_small, prepared))
    assert out_small.shape == (8, OUT_DIM)
    ref_small = reference_forward_bf16(x_small, params)
    assert jnp.allclose(out_small, ref_small, atol=1e-2, rtol=1e-2), \
        "mismatch vs bf16 reference (small batch)"
    # Loose check against the pure-f32 semantics of the original module
    # (intentional numerics change: bf16 MXU operands + bf16 output store).
    ref_f32 = reference_forward_f32(x_small, params)
    assert jnp.allclose(out_small, ref_f32, atol=7.5e-2, rtol=7.5e-2), \
        "mismatch vs f32 reference (small batch)"

    # Multi-step grid (exercises batch tiling, >=2 parallel steps, batch padding).
    x_big = jax.random.normal(kx2, (600, 1, 28, 28), jnp.float32)
    out_big = jax.block_until_ready(
        fully_connected_net(x_big, prepared, batch_tile=256))   # tb=256 -> grid=(3,)
    assert out_big.shape == (600, OUT_DIM)
    ref_big = reference_forward_bf16(x_big, params)
    assert jnp.allclose(out_big, ref_big, atol=1e-2, rtol=1e-2), \
        "mismatch vs bf16 reference (multi-tile batch)"

    print("KERNEL_OK")
</pallas_src>

<mosaic_0001>
module attributes {stable_mosaic.version = 11 : i64} {
  func.func @_mlp_kernel(%arg0: i32, %arg1: memref<8x784xbf16, #tpu.memory_space<vmem>>, %arg2: memref<784x512xbf16, #tpu.memory_space<vmem>>, %arg3: memref<1x512xf32, #tpu.memory_space<vmem>>, %arg4: memref<512x256xbf16, #tpu.memory_space<vmem>>, %arg5: memref<1x256xf32, #tpu.memory_space<vmem>>, %arg6: memref<256x128xbf16, #tpu.memory_space<vmem>>, %arg7: memref<1x128xf32, #tpu.memory_space<vmem>>, %arg8: memref<8x128xbf16, #tpu.memory_space<vmem>>) attributes {dimension_semantics = [#tpu.dimension_semantics<parallel>], iteration_bounds = array<i64: 1>, scalar_prefetch = 0 : i64, scratch_operands = 0 : i64, tpu.core_type = #tpu.core_type<tc>, window_params = [{transform_indices = @transform_0, window_bounds = array<i64: 8, 784>}, {pipeline_mode = #tpu.pipeline_mode<synchronous>, transform_indices = @transform_1, window_bounds = array<i64: 784, 512>}, {pipeline_mode = #tpu.pipeline_mode<synchronous>, transform_indices = @transform_2, window_bounds = array<i64: 1, 512>}, {pipeline_mode = #tpu.pipeline_mode<synchronous>, transform_indices = @transform_3, window_bounds = array<i64: 512, 256>}, {pipeline_mode = #tpu.pipeline_mode<synchronous>, transform_indices = @transform_4, window_bounds = array<i64: 1, 256>}, {pipeline_mode = #tpu.pipeline_mode<synchronous>, transform_indices = @transform_5, window_bounds = array<i64: 256, 128>}, {pipeline_mode = #tpu.pipeline_mode<synchronous>, transform_indices = @transform_6, window_bounds = array<i64: 1, 128>}, {transform_indices = @transform_7, window_bounds = array<i64: 8, 128>}]} {
    %c0 = arith.constant 0 : index
    %c0_0 = arith.constant 0 : index
    %0 = vector.load %arg1[%c0, %c0_0] : memref<8x784xbf16, #tpu.memory_space<vmem>>, vector<8x784xbf16>
    %c0_1 = arith.constant 0 : index
    %c0_2 = arith.constant 0 : index
    %1 = vector.load %arg2[%c0_1, %c0_2] : memref<784x512xbf16, #tpu.memory_space<vmem>>, vector<784x512xbf16>
    %cst = arith.constant dense<0.000000e+00> : vector<8x512xf32>
    %2 = tpu.matmul %0, %1, %cst {dimension_numbers = #tpu.dot_dimension_numbers<[1], [0], [0], [1], [0, 0, 1, 1], [], []>} : vector<8x784xbf16>, vector<784x512xbf16>, vector<8x512xf32> -> vector<8x512xf32>
    %c0_3 = arith.constant 0 : index
    %c0_4 = arith.constant 0 : index
    %3 = vector.load %arg3[%c0_3, %c0_4] : memref<1x512xf32, #tpu.memory_space<vmem>>, vector<1x512xf32>
    %4 = vector.broadcast %3 : vector<1x512xf32> to vector<8x512xf32>
    %5 = arith.addf %2, %4 : vector<8x512xf32>
    %cst_5 = arith.constant 0.000000e+00 : f32
    %6 = vector.broadcast %cst_5 : f32 to vector<8x512xf32>
    %7 = arith.maximumf %5, %6 : vector<8x512xf32>
    %8 = arith.truncf %7 : vector<8x512xf32> to vector<8x512xbf16>
    %c0_6 = arith.constant 0 : index
    %c0_7 = arith.constant 0 : index
    %9 = vector.load %arg4[%c0_6, %c0_7] : memref<512x256xbf16, #tpu.memory_space<vmem>>, vector<512x256xbf16>
    %cst_8 = arith.constant dense<0.000000e+00> : vector<8x256xf32>
    %10 = tpu.matmul %8, %9, %cst_8 {dimension_numbers = #tpu.dot_dimension_numbers<[1], [0], [0], [1], [0, 0, 1, 1], [], []>} : vector<8x512xbf16>, vector<512x256xbf16>, vector<8x256xf32> -> vector<8x256xf32>
    %c0_9 = arith.constant 0 : index
    %c0_10 = arith.constant 0 : index
    %11 = vector.load %arg5[%c0_9, %c0_10] : memref<1x256xf32, #tpu.memory_space<vmem>>, vector<1x256xf32>
    %12 = vector.broadcast %11 : vector<1x256xf32> to vector<8x256xf32>
    %13 = arith.addf %10, %12 : vector<8x256xf32>
    %cst_11 = arith.constant 0.000000e+00 : f32
    %14 = vector.broadcast %cst_11 : f32 to vector<8x256xf32>
    %15 = arith.maximumf %13, %14 : vector<8x256xf32>
    %16 = arith.truncf %15 : vector<8x256xf32> to vector<8x256xbf16>
    %c0_12 = arith.constant 0 : index
    %c0_13 = arith.constant 0 : index
    %17 = vector.load %arg6[%c0_12, %c0_13] : memref<256x128xbf16, #tpu.memory_space<vmem>>, vector<256x128xbf16>
    %cst_14 = arith.constant dense<0.000000e+00> : vector<8x128xf32>
    %18 = tpu.matmul %16, %17, %cst_14 {dimension_numbers = #tpu.dot_dimension_numbers<[1], [0], [0], [1], [0, 0, 1, 1], [], []>} : vector<8x256xbf16>, vector<256x128xbf16>, vector<8x128xf32> -> vector<8x128xf32>
    %c0_15 = arith.constant 0 : index
    %c0_16 = arith.constant 0 : index
    %19 = vector.load %arg7[%c0_15, %c0_16] : memref<1x128xf32, #tpu.memory_space<vmem>>, vector<1x128xf32>
    %20 = vector.broadcast %19 : vector<1x128xf32> to vector<8x128xf32>
    %21 = arith.addf %18, %20 : vector<8x128xf32>
    %22 = arith.truncf %21 : vector<8x128xf32> to vector<8x128xbf16>
    %c0_17 = arith.constant 0 : index
    %c0_18 = arith.constant 0 : index
    %23 = vector.load %arg8[%c0_17, %c0_18] : memref<8x128xbf16, #tpu.memory_space<vmem>>, vector<8x128xbf16>
    tpu.vector_store %arg8[%c0_17, %c0_18], %22 {strides = array<i32>} : memref<8x128xbf16, #tpu.memory_space<vmem>>, vector<8x128xbf16>,
    return
  }
  func.func @transform_0(%arg0: i32) -> (i32, i32) {
    %c0_i32 = arith.constant 0 : i32
    %c0_i32_0 = arith.constant 0 : i32
    return %arg0, %c0_i32 : i32, i32
  }
  func.func @transform_1(%arg0: i32) -> (i32, i32) {
    %c0_i32 = arith.constant 0 : i32
    %c0_i32_0 = arith.constant 0 : i32
    %c0_i32_1 = arith.constant 0 : i32
    return %c0_i32, %c0_i32_0 : i32, i32
  }
  func.func @transform_2(%arg0: i32) -> (i32, i32) {
    %c0_i32 = arith.constant 0 : i32
    %c0_i32_0 = arith.constant 0 : i32
    %c0_i32_1 = arith.constant 0 : i32
    return %c0_i32, %c0_i32_0 : i32, i32
  }
  func.func @transform_3(%arg0: i32) -> (i32, i32) {
    %c0_i32 = arith.constant 0 : i32
    %c0_i32_0 = arith.constant 0 : i32
    %c0_i32_1 = arith.constant 0 : i32
    return %c0_i32, %c0_i32_0 : i32, i32
  }
  func.func @transform_4(%arg0: i32) -> (i32, i32) {
    %c0_i32 = arith.constant 0 : i32
    %c0_i32_0 = arith.constant 0 : i32
    %c0_i32_1 = arith.constant 0 : i32
    return %c0_i32, %c0_i32_0 : i32, i32
  }
  func.func @transform_5(%arg0: i32) -> (i32, i32) {
    %c0_i32 = arith.constant 0 : i32
    %c0_i32_0 = arith.constant 0 : i32
    %c0_i32_1 = arith.constant 0 : i32
    return %c0_i32, %c0_i32_0 : i32, i32
  }
  func.func @transform_6(%arg0: i32) -> (i32, i32) {
    %c0_i32 = arith.constant 0 : i32
    %c0_i32_0 = arith.constant 0 : i32
    %c0_i32_1 = arith.constant 0 : i32
    return %c0_i32, %c0_i32_0 : i32, i32
  }
  func.func @transform_7(%arg0: i32) -> (i32, i32) {
    %c0_i32 = arith.constant 0 : i32
    %c0_i32_0 = arith.constant 0 : i32
    return %arg0, %c0_i32 : i32, i32
  }
}

</mosaic_0001>

<bundles_post_ra>
// kernel: fully_connected_net.1
= control target key start
LH: loop header
LB: loop body
LE: loop exit
PB: predicated region body
PF: predicated region fallthrough
CT: control target
= control target key end

     0   :  { %12 = vsyncpa [#allocation3], 0  ;;  %s4405_s0 = inlined_call_operand.vmem [shape: bf16[8,784], index: 0, kind: input, shape index: {}]   ;;  %s4406_s1 = inlined_call_operand.hbm [shape: bf16[784,512], index: 1, kind: input, shape index: {}]   ;;  %s4407_s2 = inlined_call_operand.hbm [shape: f32[1,512], index: 2, kind: input, shape index: {}]   ;;  %s4408_s3 = inlined_call_operand.vmem [shape: bf16[512,256], index: 3, kind: input, shape index: {}]   ;;  %s4409_s4 = inlined_call_operand.hbm [shape: f32[1,256], index: 4, kind: input, shape index: {}]   ;;  %s4410_s5 = inlined_call_operand.hbm [shape: bf16[256,128], index: 5, kind: input, shape index: {}]   ;;  %s4411_s6 = inlined_call_operand.hbm [shape: f32[1,128], index: 6, kind: input, shape index: {}]   ;;  %s4412_s7 = inlined_call_operand.vmem [shape: bf16[8,128], index: 7, kind: output, shape index: {}]  }
   0x1   :  { %13 = vsyncpa [#allocation5], 0  ;;  %s35_s26 = sshll.u32 %s4407_s2, 4  ;;  %s36_s26 = int_to_ptr.hbm [resolvable:$true] %s35_s26 }
   0x2   :  { %14 = vsyncpa [#allocation8], 0  ;;  %s3874_s27 = smov [#allocation4]   ;;  %s58_s8 = sshll.u32 %s4410_s5, 4  ;;  %s59_s8 = int_to_ptr.hbm [resolvable:$true] %s58_s8 }
   0x3   :  { %s37_s28 = sshll.u32 %s3874_s27, 4  ;;  %s3875_s9 = smov [#allocation7]   ;;  %s38_s28 = int_to_ptr.vmem [resolvable:$true] %s37_s28 }
   0x4   :  { %40 = dma.hbm_to_vmem [thread:$0]  %s36_s26, 64, %s38_s28, [#allocation5]  }
   0x5   :  { %s60_s10 = sshll.u32 %s3875_s9, 4  ;;  %s3876_s11 = smov 64   ;;  %s61_s10 = int_to_ptr.vmem [resolvable:$true] %s60_s10 }
   0x6   :  { %s3877_s12 = smov 4   ;;  %s21_s2 = sshll.u32 %s4406_s1, 4  ;;  %s22_s2 = int_to_ptr.hbm [resolvable:$true] %s21_s2 }
   0x7   :  { %66 = dma.hbm_to_vmem [thread:$0]  %s59_s8, 2048, %s61_s10, [#allocation8], %s3876_s11, %s3876_s11, %s3877_s12  }
   0x8   :  { %s3878_s15 = smov [#allocation2]   ;;  %s48_s5 = sshll.u32 %s4409_s4, 4  ;;  %s49_s5 = int_to_ptr.hbm [resolvable:$true] %s48_s5 }
   0x9   :  { %s23_s16 = sshll.u32 %s3878_s15, 4  ;;  %s3879_s19 = smov 256   ;;  %s24_s16 = int_to_ptr.vmem [resolvable:$true] %s23_s16 }
   0xa   :  { %s3880_s20 = smov 16   ;;  %s3881_s21 = smov [#allocation6]  }
   0xb   :  { %29 = dma.hbm_to_vmem [thread:$0]  %s22_s2, 25088, %s24_s16, [#allocation3], %s3879_s19, %s3879_s19, %s3880_s20  }
   0xc   :  { %s50_s22 = sshll.u32 %s3881_s21, 4  ;;  %s72_s25 = sshll.u32 %s4411_s6, 4  ;;  %s51_s22 = int_to_ptr.vmem [resolvable:$true] %s50_s22  ;;  %s73_s25 = int_to_ptr.hbm [resolvable:$true] %s72_s25 }
   0xd   :  { %53 = dma.hbm_to_vmem [thread:$0]  %s49_s5, 32, %s51_s22, [#allocation5]  }
   0xe   :  { %s3882_s1 = smov [#allocation9]  }
   0xf   :  { %s74_s26 = sshll.u32 %s3882_s1, 4  ;;  %s75_s26 = int_to_ptr.vmem [resolvable:$true] %s74_s26 }
  0x10   :  { %77 = dma.hbm_to_vmem [thread:$0]  %s73_s25, 16, %s75_s26, [#allocation8]  }
  0x11   :  { %3868 = dma.done.wait [#allocation3], 25088  }
  0x12   :  { %3869 = vsyncadd [#allocation3], 4294942208 }
  0x13   :  { %3870 = dma.done.wait [#allocation5], 96  }
  0x14   :  { %3871 = vsyncadd [#allocation5], 4294967200 }
  0x15   :  { %3872 = dma.done.wait [#allocation8], 2064  }
  0x16   :  { %3873 = vsyncadd [#allocation8], 4294965232  ;;  %v2468_v0 = vld [vmem:[#allocation2 + $0xe0] sm:$0xf]  ;;  %v3492_v1 = vld [vmem:[#allocation2 + $0xec] sm:$0xf0] }
  0x17   :  { %v2596_v2 = vld [vmem:[#allocation2 + $0x1e0] sm:$0xf]  ;;  %v2469_v3 = vor.u32 %v3492_v1, %v2468_v0  ;;  %v3524_v4 = vld [vmem:[#allocation2 + $0x1ec] sm:$0xf0]  ;;  %vm1313_vm0 = vcmask 130048  }
  0x18   :  { %v2724_v5 = vld [vmem:[#allocation2 + $0x2e0] sm:$0xf]  ;;  %v3556_v6 = vld [vmem:[#allocation2 + $0x2ec] sm:$0xf0]  ;;  %v2597_v7 = vor.u32 %v3524_v4, %v2596_v2 }
  0x19   :  { %v2725_v8 = vor.u32 %v3556_v6, %v2724_v5  ;;  %v2852_v9 = vld [vmem:[#allocation2 + $0x3e0] sm:$0xf]  ;;  %v3588_v10 = vld [vmem:[#allocation2 + $0x3ec] sm:$0xf0]  ;;  %1317 = vmatpush.bf16.msra.mxu0 %v2469_v3 }
  0x1a   :  { %v2452_v11 = vld [vmem:[#allocation2 + $0xc0] sm:$0xf]  ;;  %v2853_v12 = vor.u32 %v3588_v10, %v2852_v9  ;;  %v3488_v13 = vld [vmem:[#allocation2 + $0xcc] sm:$0xf0]  ;;  %1330 = vmatpush.bf16.msra.mxu1 %v2597_v7 }
  0x1b   :  { %v2580_v14 = vld [vmem:[#allocation2 + $0x1c0] sm:$0xf]  ;;  %v3520_v15 = vld [vmem:[#allocation2 + $0x1cc] sm:$0xf0]  ;;  %1343 = vmatpush.bf16.msra.mxu2 %v2725_v8  ;;  %v2453_v16 = vor.u32 %v3488_v13, %v2452_v11 }
  0x1c   :  { %v2581_v17 = vor.u32 %v3520_v15, %v2580_v14  ;;  %v2708_v18 = vld [vmem:[#allocation2 + $0x2c0] sm:$0xf]  ;;  %v3552_v19 = vld [vmem:[#allocation2 + $0x2cc] sm:$0xf0]  ;;  %1356 = vmatpush.bf16.msra.mxu3 %v2853_v12 }
  0x1d   :  { %v2836_v20 = vld [vmem:[#allocation2 + $0x3c0] sm:$0xf]  ;;  %v2709_v21 = vor.u32 %v3552_v19, %v2708_v18  ;;  %v3584_v22 = vld [vmem:[#allocation2 + $0x3cc] sm:$0xf0]  ;;  %1318 = vmatpush.bf16.msra.mxu0 %v2453_v16 }
  0x1e   :  { %v2436_v23 = vld [vmem:[#allocation2 + $0xa0] sm:$0xf]  ;;  %v3484_v24 = vld [vmem:[#allocation2 + $0xac] sm:$0xf0]  ;;  %v2837_v25 = vor.u32 %v3584_v22, %v2836_v20  ;;  %1331 = vmatpush.bf16.msra.mxu1 %v2581_v17 }
  0x1f   :  { %v2564_v26 = vld [vmem:[#allocation2 + $0x1a0] sm:$0xf]  ;;  %v3516_v27 = vld [vmem:[#allocation2 + $0x1ac] sm:$0xf0]  ;;  %v2437_v29 = vor.u32 %v3484_v24, %v2436_v23  ;;  %1344 = vmatpush.bf16.msra.mxu2 %v2709_v21 }
  0x20   :  { %v2692_v28 = vld [vmem:[#allocation2 + $0x2a0] sm:$0xf]  ;;  %v3548_v30 = vld [vmem:[#allocation2 + $0x2ac] sm:$0xf0]  ;;  %v2565_v33 = vor.u32 %v3516_v27, %v2564_v26  ;;  %1357 = vmatpush.bf16.msra.mxu3 %v2837_v25  ;;  %v100_v25 = vld [vmem:[%s4405_s0 + $0x8] sm:$0xff] }
  0x21   :  { %v2820_v31 = vld [vmem:[#allocation2 + $0x3a0] sm:$0xf]  ;;  %v3580_v32 = vld [vmem:[#allocation2 + $0x3ac] sm:$0xf0]  ;;  %v2693_v34 = vor.u32 %v3548_v30, %v2692_v28  ;;  %1319 = vmatpush.bf16.msra.mxu0 %v2437_v29 }
  0x22   :  { %v2420_v35 = vld [vmem:[#allocation2 + $0x80] sm:$0xf]  ;;  %v3480_v36 = vld [vmem:[#allocation2 + $0x8c] sm:$0xf0]  ;;  %v2821_v38 = vor.u32 %v3580_v32, %v2820_v31  ;;  %1332 = vmatpush.bf16.msra.mxu1 %v2565_v33 }
  0x23   :  { %v2548_v37 = vld [vmem:[#allocation2 + $0x180] sm:$0xf]  ;;  %v3512_v39 = vld [vmem:[#allocation2 + $0x18c] sm:$0xf0]  ;;  %v2421_v44 = vor.u32 %v3480_v36, %v2420_v35  ;;  %1345 = vmatpush.bf16.msra.mxu2 %v2693_v34  ;;  %v3490_v34 = vld [vmem:[#allocation2 + $0xe4] sm:$0xf]  ;;  %v315_v36 = vunpack.c.l.b16 %v100_v25 }
  0x24   :  { %v2676_v40 = vld [vmem:[#allocation2 + $0x280] sm:$0xf]  ;;  %v3544_v41 = vld [vmem:[#allocation2 + $0x28c] sm:$0xf0]  ;;  %v2549_v45 = vor.u32 %v3512_v39, %v2548_v37  ;;  %1358 = vmatpush.bf16.msra.mxu3 %v2821_v38  ;;  %v2470_v35 = vld [vmem:[#allocation2 + $0xf0] sm:$0xf0] }
  0x25   :  { %v2804_v42 = vld [vmem:[#allocation2 + $0x380] sm:$0xf]  ;;  %v3576_v43 = vld [vmem:[#allocation2 + $0x38c] sm:$0xf0]  ;;  %v2677_v46 = vor.u32 %v3544_v41, %v2676_v40  ;;  %1320 = vmatpush.bf16.msra.mxu0 %v2421_v44 }
  0x26   :  { %v2404_v47 = vld [vmem:[#allocation2 + $0x60] sm:$0xf]  ;;  %v3476_v48 = vld [vmem:[#allocation2 + $0x6c] sm:$0xf0]  ;;  %v2805_v50 = vor.u32 %v3576_v43, %v2804_v42  ;;  %1333 = vmatpush.bf16.msra.mxu1 %v2549_v45  ;;  %v316_v42 = vunpack.c.h.b16 %v100_v25  ;;  %v3510_v25 = vld [vmem:[#allocation2 + $0x184] sm:$0xf] }
  0x27   :  { %v2532_v49 = vld [vmem:[#allocation2 + $0x160] sm:$0xf]  ;;  %v3508_v51 = vld [vmem:[#allocation2 + $0x16c] sm:$0xf0]  ;;  %v2405_v56 = vor.u32 %v3476_v48, %v2404_v47  ;;  %1346 = vmatpush.bf16.msra.mxu2 %v2677_v46  ;;  %v3522_v46 = vld [vmem:[#allocation2 + $0x1e4] sm:$0xf] }
  0x28   :  { %v2660_v52 = vld [vmem:[#allocation2 + $0x260] sm:$0xf]  ;;  %v3540_v53 = vld [vmem:[#allocation2 + $0x26c] sm:$0xf0]  ;;  %v2533_v57 = vor.u32 %v3508_v51, %v2532_v49  ;;  %1359 = vmatpush.bf16.msra.mxu3 %v2805_v50  ;;  %v2598_v47 = vld [vmem:[#allocation2 + $0x1f0] sm:$0xf0]  ;;  %v2473_v49 = vor.u32 %v3490_v34, %v2470_v35 }
  0x29   :  { %v2788_v54 = vld [vmem:[#allocation2 + $0x360] sm:$0xf]  ;;  %v3572_v55 = vld [vmem:[#allocation2 + $0x36c] sm:$0xf0]  ;;  %v2661_v58 = vor.u32 %v3540_v53, %v2660_v52  ;;  %1321 = vmatpush.bf16.msra.mxu0 %v2405_v56  ;;  %v3944_v53 = vpack.c.b16 %v315_v36, %v315_v36  ;;  %v2454_v56 = vld [vmem:[#allocation2 + $0xd0] sm:$0xf0] }
  0x2a   :  { %v2388_v59 = vld [vmem:[#allocation2 + $0x40] sm:$0xf]  ;;  %v3472_v60 = vld [vmem:[#allocation2 + $0x4c] sm:$0xf0]  ;;  %v2789_v62 = vor.u32 %v3572_v55, %v2788_v54  ;;  %1334 = vmatpush.bf16.msra.mxu1 %v2533_v57  ;;  %v3486_v55 = vld [vmem:[#allocation2 + $0xc4] sm:$0xf] }
  0x2b   :  { %v2516_v61 = vld [vmem:[#allocation2 + $0x140] sm:$0xf]  ;;  %v3504_v63 = vld [vmem:[#allocation2 + $0x14c] sm:$0xf0]  ;;  %v2389_v4 = vor.u32 %v3472_v60, %v2388_v59  ;;  %1347 = vmatpush.bf16.msra.mxu2 %v2661_v58  ;;  %v3948_v60 = vpack.c.b16 %v316_v42, %v316_v42  ;;  %v2406_v34 = vld [vmem:[#allocation2 + $0x70] sm:$0xf0] }
  0x2c   :  { %v2644_v0 = vld [vmem:[#allocation2 + $0x240] sm:$0xf]  ;;  %v3536_v1 = vld [vmem:[#allocation2 + $0x24c] sm:$0xf0]  ;;  %v2517_v5 = vor.u32 %v3504_v63, %v2516_v61  ;;  %1360 = vmatpush.bf16.msra.mxu3 %v2789_v62  ;;  %v2601_v61 = vor.u32 %v3522_v46, %v2598_v47  ;;  %v3518_v63 = vld [vmem:[#allocation2 + $0x1c4] sm:$0xf] }
  0x2d   :  { %v2772_v2 = vld [vmem:[#allocation2 + $0x340] sm:$0xf]  ;;  %v3568_v3 = vld [vmem:[#allocation2 + $0x34c] sm:$0xf0]  ;;  %v2645_v6 = vor.u32 %v3536_v1, %v2644_v0  ;;  %1322 = vmatpush.bf16.msra.mxu0 %v2389_v4  ;;  %v2582_v0 = vld [vmem:[#allocation2 + $0x1d0] sm:$0xf0] }
  0x2e   :  { %v2372_v7 = vld [vmem:[#allocation2 + $0x20] sm:$0xf]  ;;  %v3468_v8 = vld [vmem:[#allocation2 + $0x2c] sm:$0xf0]  ;;  %v2773_v10 = vor.u32 %v3568_v3, %v2772_v2  ;;  %1335 = vmatpush.bf16.msra.mxu1 %v2517_v5  ;;  %v2457_v2 = vor.u32 %v3486_v55, %v2454_v56  ;;  %v3470_v46 = vld [vmem:[#allocation2 + $0x44] sm:$0xf] }
  0x2f   :  { %v2500_v9 = vld [vmem:[#allocation2 + $0x120] sm:$0xf]  ;;  %v3500_v11 = vld [vmem:[#allocation2 + $0x12c] sm:$0xf0]  ;;  %v2373_v17 = vor.u32 %v3468_v8, %v2372_v7  ;;  %1348 = vmatpush.bf16.msra.mxu2 %v2645_v6  ;;  %v3482_v8 = vld [vmem:[#allocation2 + $0xa4] sm:$0xf] }
  0x30   :  { %v2628_v12 = vld [vmem:[#allocation2 + $0x220] sm:$0xf]  ;;  %v3532_v13 = vld [vmem:[#allocation2 + $0x22c] sm:$0xf0]  ;;  %v2501_v21 = vor.u32 %v3500_v11, %v2500_v9  ;;  %1361 = vmatpush.bf16.msra.mxu3 %v2773_v10  ;;  %v2438_v9 = vld [vmem:[#allocation2 + $0xb0] sm:$0xf0]  ;;  %v2585_v10 = vor.u32 %v3518_v63, %v2582_v0 }
  0x31   :  { %v2756_v14 = vld [vmem:[#allocation2 + $0x320] sm:$0xf]  ;;  %v3564_v15 = vld [vmem:[#allocation2 + $0x32c] sm:$0xf0]  ;;  %v2629_v22 = vor.u32 %v3532_v13, %v2628_v12  ;;  %1323 = vmatpush.bf16.msra.mxu0 %v2373_v17  ;;  %v3514_v12 = vld [vmem:[#allocation2 + $0x1a4] sm:$0xf] }
  0x32   :  { %v2356_v16 = vld [vmem:[#allocation2] sm:$0xf]  ;;  %v3464_v18 = vld [vmem:[#allocation2 + $0xc] sm:$0xf0]  ;;  %v2757_v26 = vor.u32 %v3564_v15, %v2756_v14  ;;  %1336 = vmatpush.bf16.msra.mxu1 %v2501_v21  ;;  %v2566_v13 = vld [vmem:[#allocation2 + $0x1b0] sm:$0xf0]  ;;  %v2441_v15 = vor.u32 %v3482_v8, %v2438_v9 }
  0x33   :  { %v2484_v19 = vld [vmem:[#allocation2 + $0x100] sm:$0xf]  ;;  %v3496_v20 = vld [vmem:[#allocation2 + $0x10c] sm:$0xf0]  ;;  %v2357_v33 = vor.u32 %v3464_v18, %v2356_v16  ;;  %1349 = vmatpush.bf16.msra.mxu2 %v2629_v22  ;;  %v2422_v21 = vld [vmem:[#allocation2 + $0x90] sm:$0xf0] }
  0x34   :  { %v2612_v23 = vld [vmem:[#allocation2 + $0x200] sm:$0xf]  ;;  %v3528_v24 = vld [vmem:[#allocation2 + $0x20c] sm:$0xf0]  ;;  %v2485_v38 = vor.u32 %v3496_v20, %v2484_v19  ;;  %1362 = vmatpush.bf16.msra.mxu3 %v2757_v26  ;;  %v3478_v20 = vld [vmem:[#allocation2 + $0x84] sm:$0xf] }
  0x35   :  { %v2740_v27 = vld [vmem:[#allocation2 + $0x300] sm:$0xf]  ;;  %v3560_v28 = vld [vmem:[#allocation2 + $0x30c] sm:$0xf0]  ;;  %v2613_v39 = vor.u32 %v3528_v24, %v2612_v23  ;;  %1324 = vmatpush.bf16.msra.mxu0 %v2357_v33  ;;  %v102_v22 = vld [vmem:[%s4405_s0 + $0x18] sm:$0xf]  ;;  %v2569_v23 = vor.u32 %v3514_v12, %v2566_v13 }
  0x36   :  { %v2980_v29 = vld [vmem:[#allocation2 + $0x4e0] sm:$0xf]  ;;  %v3620_v30 = vld [vmem:[#allocation2 + $0x4ec] sm:$0xf0]  ;;  %v2741_v43 = vor.u32 %v3560_v28, %v2740_v27  ;;  %1337 = vmatpush.bf16.msra.mxu1 %v2485_v38  ;;  %v2550_v26 = vld [vmem:[#allocation2 + $0x190] sm:$0xf0]  ;;  %v2425_v28 = vor.u32 %v3478_v20, %v2422_v21  ;;  %v319_v35 = vunpack.c.l.b16 %v102_v22 }
  0x37   :  { %v3108_v31 = vld [vmem:[#allocation2 + $0x5e0] sm:$0xf]  ;;  %v3652_v32 = vld [vmem:[#allocation2 + $0x5ec] sm:$0xf0]  ;;  %v2981_v44 = vor.u32 %v3620_v30, %v2980_v29  ;;  %1350 = vmatpush.bf16.msra.mxu2 %v2613_v39  ;;  %v3474_v33 = vld [vmem:[#allocation2 + $0x64] sm:$0xf]  ;;  %v2553_v36 = vor.u32 %v3510_v25, %v2550_v26 }
  0x38   :  { %v99_v37 = vld [vmem:[%s4405_s0] sm:$0xff]  ;;  %v3656_v45 = vld [vmem:[#allocation2 + $0x60c] sm:$0xf0]  ;;  %v3109_v48 = vor.u32 %v3652_v32, %v3108_v31  ;;  %1363 = vmatpush.bf16.msra.mxu3 %v2741_v43  ;;  %v2534_v39 = vld [vmem:[#allocation2 + $0x170] sm:$0xf0] }
  0x39   :  { %v3124_v40 = vld [vmem:[#allocation2 + $0x600] sm:$0xf]  ;;  %v313_v41 = vunpack.c.l.b16 %v99_v37  ;;  %v3616_v51 = vld [vmem:[#allocation2 + $0x4cc] sm:$0xf0]  ;;  %v314_v58 = vunpack.c.h.b16 %v99_v37  ;;  %1369 = vmatpush.bf16.msrb.mxu0 %v2981_v44  ;;  %v3506_v38 = vld [vmem:[#allocation2 + $0x164] sm:$0xf] }
  0x3a   :  { %v2964_v50 = vld [vmem:[#allocation2 + $0x4c0] sm:$0xf]  ;;  %v3648_v54 = vld [vmem:[#allocation2 + $0x5cc] sm:$0xf0]  ;;  %v3125_v59 = vor.u32 %v3656_v45, %v3124_v40  ;;  %1382 = vmatpush.bf16.msrb.mxu1 %v3109_v48  ;;  %1351 = vmatmul.bf16.vlgmr.msra.gmra.mxu2 %v3944_v53  ;;  %v2390_v47 = vld [vmem:[#allocation2 + $0x50] sm:$0xf0]  ;;  %v3959_v48 = vpack.c.b16 %v319_v35, %v319_v35 }
  0x3b   :  { %v3092_v52 = vld [vmem:[#allocation2 + $0x5c0] sm:$0xf]  ;;  %v3946_v57 = vpack.c.b16 %v313_v41, %v313_v41  ;;  %v2965_v62 = vor.u32 %v3616_v51, %v2964_v50  ;;  %v3612_v4 = vld [vmem:[#allocation2 + $0x4ac] sm:$0xf0]  ;;  %v3952_v6 = vpack.c.b16 %v314_v58, %v314_v58  ;;  %1364 = vmatmul.bf16.vlgmr.msra.gmra.mxu3 %v3948_v60  ;;  %v2409_v41 = vor.u32 %v3474_v33, %v2406_v34  ;;  %v3502_v51 = vld [vmem:[#allocation2 + $0x144] sm:$0xf] }
  0x3c   :  { %1408 = vmatpush.bf16.msrb.mxu3 %v2473_v49  ;;  %v3093_v1 = vor.u32 %v3648_v54, %v3092_v52  ;;  %v2948_v3 = vld [vmem:[#allocation2 + $0x4a0] sm:$0xf]  ;;  %v3644_v7 = vld [vmem:[#allocation2 + $0x5ac] sm:$0xf0]  ;;  %1402 = vmatpush.bf16.msrb.mxu2 %v3125_v59  ;;  %v2537_v49 = vor.u32 %v3506_v38, %v2534_v39  ;;  %v2518_v52 = vld [vmem:[#allocation2 + $0x150] sm:$0xf0]  ;;  %v2393_v55 = vor.u32 %v3470_v46, %v2390_v47 }
  0x3d   :  { %v3076_v5 = vld [vmem:[#allocation2 + $0x5a0] sm:$0xf]  ;;  %1325 = vmatmul.bf16.vlgmr.msra.gmra.mxu0 %v3946_v57  ;;  %v2949_v11 = vor.u32 %v3612_v4, %v2948_v3  ;;  %v3608_v17 = vld [vmem:[#allocation2 + $0x48c] sm:$0xf0]  ;;  %1338 = vmatmul.bf16.vlgmr.msra.gmra.mxu1 %v3952_v6  ;;  %v2374_v63 = vld [vmem:[#allocation2 + $0x30] sm:$0xf0] }
  0x3e   :  { %1370 = vmatpush.bf16.msrb.mxu0 %v2965_v62  ;;  %1383 = vmatpush.bf16.msrb.mxu1 %v3093_v1  ;;  %v3077_v14 = vor.u32 %v3644_v7, %v3076_v5  ;;  %v2932_v16 = vld [vmem:[#allocation2 + $0x480] sm:$0xf]  ;;  %v3640_v19 = vld [vmem:[#allocation2 + $0x58c] sm:$0xf0]  ;;  %v3466_v62 = vld [vmem:[#allocation2 + $0x24] sm:$0xf]  ;;  %v2521_v1 = vor.u32 %v3502_v51, %v2518_v52 }
  0x3f   :  { %v3060_v18 = vld [vmem:[#allocation2 + $0x580] sm:$0xf]  ;;  %v2933_v24 = vor.u32 %v3608_v17, %v2932_v16  ;;  %v3604_v30 = vld [vmem:[#allocation2 + $0x46c] sm:$0xf0]  ;;  %v3498_v0 = vld [vmem:[#allocation2 + $0x124] sm:$0xf]  ;;  %v2377_v8 = vor.u32 %v3466_v62, %v2374_v63 }
  0x40   :  { %1421 = vmatpush.bf16.msra.mxu2 %v2601_v61  ;;  %1409 = vmatpush.bf16.msrb.mxu3 %v2457_v2  ;;  %v3061_v27 = vor.u32 %v3640_v19, %v3060_v18  ;;  %v2916_v29 = vld [vmem:[#allocation2 + $0x460] sm:$0xf]  ;;  %v3636_v32 = vld [vmem:[#allocation2 + $0x56c] sm:$0xf0]  ;;  %v2502_v3 = vld [vmem:[#allocation2 + $0x130] sm:$0xf0] }
  0x41   :  { %v3044_v31 = vld [vmem:[#allocation2 + $0x560] sm:$0xf]  ;;  %v2917_v37 = vor.u32 %v3604_v30, %v2916_v29  ;;  %v3600_v43 = vld [vmem:[#allocation2 + $0x44c] sm:$0xf0]  ;;  %v3462_v12 = vld [vmem:[#allocation2 + $0x4] sm:$0xf]  ;;  %v2505_v19 = vor.u32 %v3498_v0, %v2502_v3 }
  0x42   :  { %1371 = vmatpush.bf16.msrb.mxu0 %v2949_v11  ;;  %1384 = vmatpush.bf16.msrb.mxu1 %v3077_v14  ;;  %v3045_v40 = vor.u32 %v3636_v32, %v3044_v31  ;;  %v2900_v42 = vld [vmem:[#allocation2 + $0x440] sm:$0xf]  ;;  %v3632_v45 = vld [vmem:[#allocation2 + $0x54c] sm:$0xf0]  ;;  %v2358_v13 = vld [vmem:[#allocation2 + $0x10] sm:$0xf0] }
  0x43   :  { %v3028_v44 = vld [vmem:[#allocation2 + $0x540] sm:$0xf]  ;;  %v2901_v50 = vor.u32 %v3600_v43, %v2900_v42  ;;  %v3596_v58 = vld [vmem:[#allocation2 + $0x42c] sm:$0xf0]  ;;  %v3554_v14 = vld [vmem:[#allocation2 + $0x2e4] sm:$0xf]  ;;  %v2361_v25 = vor.u32 %v3462_v12, %v2358_v13 }
  0x44   :  { %1422 = vmatpush.bf16.msra.mxu2 %v2585_v10  ;;  %1410 = vmatpush.bf16.msrb.mxu3 %v2441_v15  ;;  %v3029_v54 = vor.u32 %v3632_v45, %v3028_v44  ;;  %v2884_v56 = vld [vmem:[#allocation2 + $0x420] sm:$0xf]  ;;  %v3628_v61 = vld [vmem:[#allocation2 + $0x52c] sm:$0xf0]  ;;  %v2726_v15 = vld [vmem:[#allocation2 + $0x2f0] sm:$0xf0] }
  0x45   :  { %v3012_v59 = vld [vmem:[#allocation2 + $0x520] sm:$0xf]  ;;  %v2885_v2 = vor.u32 %v3596_v58, %v2884_v56  ;;  %v101_v5 = vld [vmem:[%s4405_s0 + $0x10] sm:$0xff]  ;;  %v3586_v16 = vld [vmem:[#allocation2 + $0x3e4] sm:$0xf] }
  0x46   :  { %1372 = vmatpush.bf16.msrb.mxu0 %v2933_v24  ;;  %1385 = vmatpush.bf16.msrb.mxu1 %v3061_v27  ;;  %v2868_v4 = vld [vmem:[#allocation2 + $0x400] sm:$0xf]  ;;  %v3013_v7 = vor.u32 %v3628_v61, %v3012_v59  ;;  %v3592_v9 = vld [vmem:[#allocation2 + $0x40c] sm:$0xf0]  ;;  %v2854_v17 = vld [vmem:[#allocation2 + $0x3f0] sm:$0xf0]  ;;  %v317_v18 = vunpack.c.l.b16 %v101_v5 }
  0x47   :  { %v2996_v10 = vld [vmem:[#allocation2 + $0x500] sm:$0xf]  ;;  %v3624_v11 = vld [vmem:[#allocation2 + $0x50c] sm:$0xf0]  ;;  %v2869_v20 = vor.u32 %v3592_v9, %v2868_v4  ;;  %v3618_v21 = vld [vmem:[#allocation2 + $0x4e4] sm:$0xf]  ;;  %v2857_v29 = vor.u32 %v3586_v16, %v2854_v17 }
  0x48   :  { %1423 = vmatpush.bf16.msra.mxu2 %v2569_v23  ;;  %1411 = vmatpush.bf16.msrb.mxu3 %v2425_v28  ;;  %v2982_v22 = vld [vmem:[#allocation2 + $0x4f0] sm:$0xf0]  ;;  %v318_v23 = vunpack.c.h.b16 %v101_v5  ;;  %v2997_v24 = vor.u32 %v3624_v11, %v2996_v10  ;;  %v3494_v26 = vld [vmem:[#allocation2 + $0x104] sm:$0xf]  ;;  %v2729_v28 = vor.u32 %v3554_v14, %v2726_v15  ;;  %v3966_v34 = vpack.c.b16 %v317_v18, %v317_v18 }
  0x49   :  { %v2486_v27 = vld [vmem:[#allocation2 + $0x110] sm:$0xf0]  ;;  %v3650_v30 = vld [vmem:[#allocation2 + $0x5e4] sm:$0xf]  ;;  %v2985_v33 = vor.u32 %v3618_v21, %v2982_v22 }
  0x4a   :  { %1373 = vmatpush.bf16.msrb.mxu0 %v2917_v37  ;;  %1386 = vmatpush.bf16.msrb.mxu1 %v3045_v40  ;;  %v3110_v31 = vld [vmem:[#allocation2 + $0x5f0] sm:$0xf0]  ;;  %v3550_v32 = vld [vmem:[#allocation2 + $0x2c4] sm:$0xf]  ;;  %v2489_v38 = vor.u32 %v3494_v26, %v2486_v27  ;;  %v3968_v39 = vpack.c.b16 %v318_v23, %v318_v23 }
  0x4b   :  { %3138 = vmatmul.msk.bf16.vlgmr.msrb.gmra.mxu2 %vm1313_vm0, %v3959_v48  ;;  %v2710_v35 = vld [vmem:[#allocation2 + $0x2d0] sm:$0xf0]  ;;  %v3614_v40 = vld [vmem:[#allocation2 + $0x4c4] sm:$0xf]  ;;  %v3113_v42 = vor.u32 %v3650_v30, %v3110_v31 }
  0x4c   :  { %1424 = vmatpush.bf16.msra.mxu2 %v2553_v36  ;;  %1412 = vmatpush.bf16.msrb.mxu3 %v2409_v41  ;;  %v3582_v36 = vld [vmem:[#allocation2 + $0x3c4] sm:$0xf]  ;;  %v2838_v37 = vld [vmem:[#allocation2 + $0x3d0] sm:$0xf0]  ;;  %v2713_v43 = vor.u32 %v3550_v32, %v2710_v35 }
  0x4d   :  { %v2966_v41 = vld [vmem:[#allocation2 + $0x4d0] sm:$0xf0]  ;;  %v2841_v44 = vor.u32 %v3582_v36, %v2838_v37  ;;  %v3646_v45 = vld [vmem:[#allocation2 + $0x5c4] sm:$0xf] }
  0x4e   :  { %1374 = vmatpush.bf16.msrb.mxu0 %v2901_v50  ;;  %1387 = vmatpush.bf16.msrb.mxu1 %v3029_v54  ;;  %v3094_v46 = vld [vmem:[#allocation2 + $0x5d0] sm:$0xf0]  ;;  %v3546_v47 = vld [vmem:[#allocation2 + $0x2a4] sm:$0xf] }
  0x4f   :  { %v2694_v50 = vld [vmem:[#allocation2 + $0x2b0] sm:$0xf0]  ;;  %v3578_v51 = vld [vmem:[#allocation2 + $0x3a4] sm:$0xf]  ;;  %v3097_v56 = vor.u32 %v3646_v45, %v3094_v46 }
  0x50   :  { %1425 = vmatpush.bf16.msra.mxu2 %v2537_v49  ;;  %1413 = vmatpush.bf16.msrb.mxu3 %v2393_v55  ;;  %v2969_v49 = vor.u32 %v3614_v40, %v2966_v41  ;;  %v2822_v52 = vld [vmem:[#allocation2 + $0x3b0] sm:$0xf0]  ;;  %v3610_v54 = vld [vmem:[#allocation2 + $0x4a4] sm:$0xf]  ;;  %v2697_v58 = vor.u32 %v3546_v47, %v2694_v50 }
  0x51   :  { %v2950_v55 = vld [vmem:[#allocation2 + $0x4b0] sm:$0xf0]  ;;  %v2825_v59 = vor.u32 %v3578_v51, %v2822_v52  ;;  %v3642_v61 = vld [vmem:[#allocation2 + $0x5a4] sm:$0xf] }
  0x52   :  { %1375 = vmatpush.bf16.msrb.mxu0 %v2885_v2  ;;  %1388 = vmatpush.bf16.msrb.mxu1 %v3013_v7  ;;  %v3078_v62 = vld [vmem:[#allocation2 + $0x5b0] sm:$0xf0]  ;;  %v3542_v63 = vld [vmem:[#allocation2 + $0x284] sm:$0xf]  ;;  %v2953_v0 = vor.u32 %v3610_v54, %v2950_v55 }
  0x53   :  { %v3574_v2 = vld [vmem:[#allocation2 + $0x384] sm:$0xf]  ;;  %v2806_v3 = vld [vmem:[#allocation2 + $0x390] sm:$0xf0]  ;;  %v3081_v7 = vor.u32 %v3642_v61, %v3078_v62  ;;  %v2476_v61 = vld [vmem:[#allocation2 + $0xe8] sm:$0xf] }
  0x54   :  { %1426 = vmatpush.bf16.msra.mxu2 %v2521_v1  ;;  %1414 = vmatpush.bf16.msrb.mxu3 %v2377_v8  ;;  %v2678_v1 = vld [vmem:[#allocation2 + $0x290] sm:$0xf0]  ;;  %v3606_v4 = vld [vmem:[#allocation2 + $0x484] sm:$0xf]  ;;  %v2809_v9 = vor.u32 %v3574_v2, %v2806_v3  ;;  %v3493_v62 = vld [vmem:[#allocation2 + $0xf4] sm:$0xf0] }
  0x55   :  { %v2934_v5 = vld [vmem:[#allocation2 + $0x490] sm:$0xf0]  ;;  %v2681_v8 = vor.u32 %v3542_v63, %v2678_v1  ;;  %v3638_v10 = vld [vmem:[#allocation2 + $0x584] sm:$0xf]  ;;  %v2604_v63 = vld [vmem:[#allocation2 + $0x1e8] sm:$0xf] }
  0x56   :  { %1376 = vmatpush.bf16.msrb.mxu0 %v2869_v20  ;;  %1389 = vmatpush.bf16.msrb.mxu1 %v2997_v24  ;;  %v3062_v11 = vld [vmem:[#allocation2 + $0x590] sm:$0xf0]  ;;  %v3538_v12 = vld [vmem:[#allocation2 + $0x264] sm:$0xf]  ;;  %v2937_v13 = vor.u32 %v3606_v4, %v2934_v5  ;;  %v3525_v1 = vld [vmem:[#allocation2 + $0x1f4] sm:$0xf0] }
  0x57   :  { %v2662_v14 = vld [vmem:[#allocation2 + $0x270] sm:$0xf0]  ;;  %v3570_v15 = vld [vmem:[#allocation2 + $0x364] sm:$0xf] }
  0x58   :  { %1427 = vmatpush.bf16.msra.mxu2 %v2505_v19  ;;  %1415 = vmatpush.bf16.msrb.mxu3 %v2361_v25  ;;  %v2790_v16 = vld [vmem:[#allocation2 + $0x370] sm:$0xf0]  ;;  %v3602_v17 = vld [vmem:[#allocation2 + $0x464] sm:$0xf]  ;;  %v3065_v19 = vor.u32 %v3638_v10, %v3062_v11  ;;  %v2665_v20 = vor.u32 %v3538_v12, %v2662_v14  ;;  %v2477_v10 = vor.u32 %v3493_v62, %v2476_v61  ;;  %v2860_v11 = vld [vmem:[#allocation2 + $0x3e8] sm:$0xf] }
  0x59   :  { %1377 = vmatmul.bf16.vlgmr.msrb.gmra.mxu0 %v3966_v34  ;;  %1390 = vmatmul.bf16.vlgmr.msrb.gmra.mxu1 %v3968_v39  ;;  %v2918_v18 = vld [vmem:[#allocation2 + $0x470] sm:$0xf0]  ;;  %v2793_v21 = vor.u32 %v3570_v15, %v2790_v16  ;;  %v3634_v22 = vld [vmem:[#allocation2 + $0x564] sm:$0xf]  ;;  %v3589_v12 = vld [vmem:[#allocation2 + $0x3f4] sm:$0xf0]  ;;  %v2605_v14 = vor.u32 %v3525_v1, %v2604_v63 }
  0x5a   :  { %1434 = vmatpush.bf16.msra.mxu0 %v2729_v28  ;;  %1447 = vmatpush.bf16.msra.mxu1 %v2857_v29  ;;  %v3046_v23 = vld [vmem:[#allocation2 + $0x570] sm:$0xf0]  ;;  %v3534_v24 = vld [vmem:[#allocation2 + $0x244] sm:$0xf]  ;;  %v2921_v25 = vor.u32 %v3602_v17, %v2918_v18  ;;  %v3489_v15 = vld [vmem:[#allocation2 + $0xd4] sm:$0xf0] }
  0x5b   :  { %1416 = vmatmul.bf16.vlgmr.msrb.gmra.mxu3 %v3946_v57  ;;  %v2646_v26 = vld [vmem:[#allocation2 + $0x250] sm:$0xf0]  ;;  %v3566_v27 = vld [vmem:[#allocation2 + $0x344] sm:$0xf]  ;;  %v3049_v31 = vor.u32 %v3634_v22, %v3046_v23  ;;  %v2732_v17 = vld [vmem:[#allocation2 + $0x2e8] sm:$0xf]  ;;  %v2861_v22 = vor.u32 %v3589_v12, %v2860_v11 }
  0x5c   :  { %1460 = vmatpush.bf16.msra.mxu3 %v2985_v33  ;;  %1428 = vmatpush.bf16.msra.mxu2 %v2489_v38  ;;  %v2774_v28 = vld [vmem:[#allocation2 + $0x350] sm:$0xf0]  ;;  %v3598_v29 = vld [vmem:[#allocation2 + $0x444] sm:$0xf]  ;;  %v2649_v33 = vor.u32 %v3534_v24, %v2646_v26  ;;  %v3557_v18 = vld [vmem:[#allocation2 + $0x2f4] sm:$0xf0] }
  0x5d   :  { %v2902_v30 = vld [vmem:[#allocation2 + $0x450] sm:$0xf0]  ;;  %v3630_v32 = vld [vmem:[#allocation2 + $0x544] sm:$0xf]  ;;  %v2777_v35 = vor.u32 %v3566_v27, %v2774_v28  ;;  %v2844_v24 = vld [vmem:[#allocation2 + $0x3c8] sm:$0xf]  ;;  %v2733_v27 = vor.u32 %v3557_v18, %v2732_v17 }
  0x5e   :  { %1435 = vmatpush.bf16.msra.mxu0 %v2713_v43  ;;  %1448 = vmatpush.bf16.msra.mxu1 %v2841_v44  ;;  %v3030_v36 = vld [vmem:[#allocation2 + $0x550] sm:$0xf0]  ;;  %v3530_v37 = vld [vmem:[#allocation2 + $0x224] sm:$0xf]  ;;  %v2905_v40 = vor.u32 %v3598_v29, %v2902_v30  ;;  %v2444_v26 = vld [vmem:[#allocation2 + $0xa8] sm:$0xf] }
  0x5f   :  { %1429 = vmatmul.bf16.vlgmr.msra.gmra.mxu2 %v3952_v6  ;;  %v2630_v38 = vld [vmem:[#allocation2 + $0x230] sm:$0xf0]  ;;  %v3562_v41 = vld [vmem:[#allocation2 + $0x324] sm:$0xf]  ;;  %v3033_v45 = vor.u32 %v3630_v32, %v3030_v36  ;;  %v3485_v29 = vld [vmem:[#allocation2 + $0xb4] sm:$0xf0] }
  0x60   :  { %1473 = vmatpush.bf16.msrb.mxu2 %v3113_v42  ;;  %1461 = vmatpush.bf16.msra.mxu3 %v2969_v49  ;;  %v2758_v42 = vld [vmem:[#allocation2 + $0x330] sm:$0xf0]  ;;  %v3594_v43 = vld [vmem:[#allocation2 + $0x424] sm:$0xf]  ;;  %v2633_v49 = vor.u32 %v3530_v37, %v2630_v38  ;;  %v2716_v30 = vld [vmem:[#allocation2 + $0x2c8] sm:$0xf]  ;;  %v2445_v36 = vor.u32 %v3485_v29, %v2444_v26 }
  0x61   :  { %v2886_v44 = vld [vmem:[#allocation2 + $0x430] sm:$0xf0]  ;;  %v3626_v46 = vld [vmem:[#allocation2 + $0x524] sm:$0xf]  ;;  %v2761_v50 = vor.u32 %v3562_v41, %v2758_v42  ;;  %v2572_v32 = vld [vmem:[#allocation2 + $0x1a8] sm:$0xf] }
  0x62   :  { %1436 = vmatpush.bf16.msra.mxu0 %v2697_v58  ;;  %1449 = vmatpush.bf16.msra.mxu1 %v2825_v59  ;;  %v3014_v47 = vld [vmem:[#allocation2 + $0x530] sm:$0xf0]  ;;  %v3526_v51 = vld [vmem:[#allocation2 + $0x204] sm:$0xf]  ;;  %v2889_v55 = vor.u32 %v3594_v43, %v2886_v44  ;;  %v2828_v37 = vld [vmem:[#allocation2 + $0x3a8] sm:$0xf] }
  0x63   :  { %v2614_v52 = vld [vmem:[#allocation2 + $0x210] sm:$0xf0]  ;;  %v3558_v54 = vld [vmem:[#allocation2 + $0x304] sm:$0xf]  ;;  %v3581_v38 = vld [vmem:[#allocation2 + $0x3b4] sm:$0xf0] }
  0x64   :  { %1474 = vmatpush.bf16.msrb.mxu2 %v3097_v56  ;;  %1462 = vmatpush.bf16.msra.mxu3 %v2953_v0  ;;  %v2742_v56 = vld [vmem:[#allocation2 + $0x310] sm:$0xf0]  ;;  %v3590_v58 = vld [vmem:[#allocation2 + $0x404] sm:$0xf]  ;;  %v3017_v0 = vor.u32 %v3626_v46, %v3014_v47  ;;  %v2617_v4 = vor.u32 %v3526_v51, %v2614_v52  ;;  %v3481_v43 = vld [vmem:[#allocation2 + $0x94] sm:$0xf0] }
  0x65   :  { %v2870_v59 = vld [vmem:[#allocation2 + $0x410] sm:$0xf0]  ;;  %v3654_v2 = vld [vmem:[#allocation2 + $0x604] sm:$0xf]  ;;  %v2745_v5 = vor.u32 %v3558_v54, %v2742_v56  ;;  %v2700_v44 = vld [vmem:[#allocation2 + $0x2a8] sm:$0xf] }
  0x66   :  { %1437 = vmatpush.bf16.msra.mxu0 %v2681_v8  ;;  %1450 = vmatpush.bf16.msra.mxu1 %v2809_v9  ;;  %v3126_v3 = vld [vmem:[#allocation2 + $0x610] sm:$0xf0]  ;;  %v2873_v9 = vor.u32 %v3590_v58, %v2870_v59  ;;  %v2556_v46 = vld [vmem:[#allocation2 + $0x188] sm:$0xf]  ;;  %v3513_v47 = vld [vmem:[#allocation2 + $0x194] sm:$0xf0] }
  0x67   :  { %v2998_v8 = vld [vmem:[#allocation2 + $0x510] sm:$0xf0]  ;;  %v3129_v16 = vor.u32 %v3654_v2, %v3126_v3  ;;  %v2812_v51 = vld [vmem:[#allocation2 + $0x388] sm:$0xf]  ;;  %v3577_v52 = vld [vmem:[#allocation2 + $0x394] sm:$0xf0]  ;;  %v2557_v56 = vor.u32 %v3513_v47, %v2556_v46 }
  0x68   :  { %1475 = vmatpush.bf16.msrb.mxu2 %v3081_v7  ;;  %1463 = vmatpush.bf16.msra.mxu3 %v2937_v13  ;;  %v3622_v7 = vld [vmem:[#allocation2 + $0x504] sm:$0xf]  ;;  %v2460_v13 = vld [vmem:[#allocation2 + $0xc8] sm:$0xf]  ;;  %v3477_v58 = vld [vmem:[#allocation2 + $0x74] sm:$0xf0] }
  0x69   :  { %v2461_v23 = vor.u32 %v3489_v15, %v2460_v13  ;;  %v2412_v54 = vld [vmem:[#allocation2 + $0x68] sm:$0xf]  ;;  %v3545_v61 = vld [vmem:[#allocation2 + $0x294] sm:$0xf0] }
  0x6a   :  { %1438 = vmatpush.bf16.msra.mxu0 %v2665_v20  ;;  %1451 = vmatpush.bf16.msra.mxu1 %v2793_v21  ;;  %v2588_v20 = vld [vmem:[#allocation2 + $0x1c8] sm:$0xf]  ;;  %v3521_v21 = vld [vmem:[#allocation2 + $0x1d4] sm:$0xf0]  ;;  %v2413_v1 = vor.u32 %v3477_v58, %v2412_v54 }
  0x6b   :  { %v2589_v28 = vor.u32 %v3521_v21, %v2588_v20  ;;  %v2684_v59 = vld [vmem:[#allocation2 + $0x288] sm:$0xf]  ;;  %v3509_v63 = vld [vmem:[#allocation2 + $0x174] sm:$0xf0] }
  0x6c   :  { %1476 = vmatpush.bf16.msrb.mxu2 %v3065_v19  ;;  %1464 = vmatpush.bf16.msra.mxu3 %v2921_v25  ;;  %v3001_v19 = vor.u32 %v3622_v7, %v2998_v8  ;;  %v3585_v25 = vld [vmem:[#allocation2 + $0x3d4] sm:$0xf0]  ;;  %v2540_v62 = vld [vmem:[#allocation2 + $0x168] sm:$0xf] }
  0x6d   :  { %v2796_v2 = vld [vmem:[#allocation2 + $0x368] sm:$0xf]  ;;  %v3573_v3 = vld [vmem:[#allocation2 + $0x374] sm:$0xf0]  ;;  %v2541_v7 = vor.u32 %v3509_v63, %v2540_v62 }
  0x6e   :  { %1439 = vmatpush.bf16.msra.mxu0 %v2649_v33  ;;  %1452 = vmatpush.bf16.msra.mxu1 %v2777_v35  ;;  %v3517_v33 = vld [vmem:[#allocation2 + $0x1b4] sm:$0xf0]  ;;  %v2845_v35 = vor.u32 %v3585_v25, %v2844_v24  ;;  %v2524_v11 = vld [vmem:[#allocation2 + $0x148] sm:$0xf]  ;;  %v2797_v13 = vor.u32 %v3573_v3, %v2796_v2 }
  0x6f   :  { %v2573_v42 = vor.u32 %v3517_v33, %v2572_v32  ;;  %v3473_v8 = vld [vmem:[#allocation2 + $0x54] sm:$0xf0]  ;;  %v2780_v15 = vld [vmem:[#allocation2 + $0x348] sm:$0xf] }
  0x70   :  { %1477 = vmatpush.bf16.msrb.mxu2 %v3049_v31  ;;  %1465 = vmatpush.bf16.msra.mxu3 %v2905_v40  ;;  %v3553_v31 = vld [vmem:[#allocation2 + $0x2d4] sm:$0xf0]  ;;  %v2428_v40 = vld [vmem:[#allocation2 + $0x88] sm:$0xf] }
  0x71   :  { %v2717_v41 = vor.u32 %v3553_v31, %v2716_v30  ;;  %v3505_v12 = vld [vmem:[#allocation2 + $0x154] sm:$0xf0]  ;;  %v2380_v17 = vld [vmem:[#allocation2 + $0x28] sm:$0xf] }
  0x72   :  { %1440 = vmatpush.bf16.msra.mxu0 %v2633_v49  ;;  %1453 = vmatpush.bf16.msra.mxu1 %v2761_v50  ;;  %v2829_v49 = vor.u32 %v3581_v38, %v2828_v37  ;;  %v2429_v50 = vor.u32 %v3481_v43, %v2428_v40  ;;  %v3469_v20 = vld [vmem:[#allocation2 + $0x34] sm:$0xf0]  ;;  %v2652_v21 = vld [vmem:[#allocation2 + $0x248] sm:$0xf] }
  0x73   :  { %v3501_v24 = vld [vmem:[#allocation2 + $0x134] sm:$0xf0]  ;;  %v2764_v26 = vld [vmem:[#allocation2 + $0x328] sm:$0xf] }
  0x74   :  { %1478 = vmatpush.bf16.msrb.mxu2 %v3033_v45  ;;  %1466 = vmatpush.bf16.msra.mxu3 %v2889_v55  ;;  %v3549_v45 = vld [vmem:[#allocation2 + $0x2b4] sm:$0xf0]  ;;  %v2364_v29 = vld [vmem:[#allocation2 + $0x8] sm:$0xf] }
  0x75   :  { %v2701_v55 = vor.u32 %v3549_v45, %v2700_v44  ;;  %v3465_v30 = vld [vmem:[#allocation2 + $0x14] sm:$0xf0]  ;;  %v2492_v33 = vld [vmem:[#allocation2 + $0x108] sm:$0xf] }
  0x76   :  { %1441 = vmatpush.bf16.msra.mxu0 %v2617_v4  ;;  %1454 = vmatpush.bf16.msra.mxu1 %v2745_v5  ;;  %v2396_v4 = vld [vmem:[#allocation2 + $0x48] sm:$0xf]  ;;  %v2685_v5 = vor.u32 %v3545_v61, %v2684_v59  ;;  %v3497_v37 = vld [vmem:[#allocation2 + $0x114] sm:$0xf0]  ;;  %v2365_v45 = vor.u32 %v3465_v30, %v2364_v29  ;;  %v3479_v29 = vld [vmem:[#allocation2 + $0x8c] sm:$0xf] }
  0x77   :  { %v2988_v38 = vld [vmem:[#allocation2 + $0x4e8] sm:$0xf]  ;;  %v3621_v40 = vld [vmem:[#allocation2 + $0x4f4] sm:$0xf0] }
  0x78   :  { %1479 = vmatpush.bf16.msrb.mxu2 %v3017_v0  ;;  %1467 = vmatpush.bf16.msra.mxu3 %v2873_v9  ;;  %v2813_v0 = vor.u32 %v3577_v52, %v2812_v51  ;;  %v2668_v9 = vld [vmem:[#allocation2 + $0x268] sm:$0xf]  ;;  %v3653_v43 = vld [vmem:[#allocation2 + $0x5f4] sm:$0xf0]  ;;  %v2493_v51 = vor.u32 %v3497_v37, %v2492_v33  ;;  %v2989_v52 = vor.u32 %v3621_v40, %v2988_v38  ;;  %v3515_v33 = vld [vmem:[#allocation2 + $0x1ac] sm:$0xf] }
  0x79   :  { %1442 = vmatmul.bf16.vlgmr.msra.gmra.mxu0 %v3944_v53  ;;  %1455 = vmatmul.bf16.vlgmr.msra.gmra.mxu1 %v3948_v60  ;;  %v2748_v44 = vld [vmem:[#allocation2 + $0x308] sm:$0xf]  ;;  %v3561_v46 = vld [vmem:[#allocation2 + $0x314] sm:$0xf0] }
  0x7a   :  { %1499 = vmatpush.bf16.msrb.mxu1 %v2477_v10  ;;  %1493 = vmatpush.bf16.msrb.mxu0 %v3129_v16  ;;  %v3541_v10 = vld [vmem:[#allocation2 + $0x274] sm:$0xf0]  ;;  %v2972_v54 = vld [vmem:[#allocation2 + $0x4c8] sm:$0xf]  ;;  %v2749_v63 = vor.u32 %v3561_v46, %v2748_v44  ;;  %v2414_v46 = vld [vmem:[#allocation2 + $0x78] sm:$0xf0] }
  0x7b   :  { %1468 = vmatmul.bf16.vlgmr.msra.gmra.mxu3 %v3966_v34  ;;  %v3569_v16 = vld [vmem:[#allocation2 + $0x354] sm:$0xf0]  ;;  %v2669_v18 = vor.u32 %v3541_v10, %v2668_v9  ;;  %v3132_v61 = vld [vmem:[#allocation2 + $0x608] sm:$0xf]  ;;  %v3523_v9 = vld [vmem:[#allocation2 + $0x1ec] sm:$0xf] }
  0x7c   :  { %1512 = vmatpush.bf16.msrb.mxu3 %v2605_v14  ;;  %1480 = vmatpush.bf16.msrb.mxu2 %v3001_v19  ;;  %v2397_v14 = vor.u32 %v3473_v8, %v2396_v4  ;;  %v2525_v19 = vor.u32 %v3505_v12, %v2524_v11  ;;  %v2781_v25 = vor.u32 %v3569_v16, %v2780_v15  ;;  %v3617_v59 = vld [vmem:[#allocation2 + $0x4d4] sm:$0xf0]  ;;  %v3487_v4 = vld [vmem:[#allocation2 + $0xcc] sm:$0xf]  ;;  %v2606_v10 = vld [vmem:[#allocation2 + $0x1f8] sm:$0xf0] }
  0x7d   :  { %v3657_v62 = vld [vmem:[#allocation2 + $0x614] sm:$0xf0]  ;;  %v2956_v12 = vld [vmem:[#allocation2 + $0x4a8] sm:$0xf] }
  0x7e   :  { %1500 = vmatpush.bf16.msrb.mxu1 %v2461_v23  ;;  %1525 = vmatpush.bf16.msra.mxu0 %v2733_v27  ;;  %v2508_v23 = vld [vmem:[#allocation2 + $0x128] sm:$0xf]  ;;  %v2381_v27 = vor.u32 %v3469_v20, %v2380_v17  ;;  %v3133_v8 = vor.u32 %v3657_v62, %v3132_v61  ;;  %v3645_v15 = vld [vmem:[#allocation2 + $0x5b4] sm:$0xf0]  ;;  %v3483_v17 = vld [vmem:[#allocation2 + $0xac] sm:$0xf] }
  0x7f   :  { %1481 = vmatmul.bf16.vlgmr.msrb.gmra.mxu2 %v3968_v39  ;;  %v2509_v32 = vor.u32 %v3501_v24, %v2508_v23  ;;  %v2446_v20 = vld [vmem:[#allocation2 + $0xb8] sm:$0xf0]  ;;  %v2940_v24 = vld [vmem:[#allocation2 + $0x488] sm:$0xf]  ;;  %v3605_v38 = vld [vmem:[#allocation2 + $0x474] sm:$0xf0] }
  0x80   :  { %1538 = vmatpush.bf16.msra.mxu2 %v2861_v22  ;;  %1513 = vmatpush.bf16.msrb.mxu3 %v2589_v28  ;;  %v3537_v22 = vld [vmem:[#allocation2 + $0x254] sm:$0xf0]  ;;  %v2924_v37 = vld [vmem:[#allocation2 + $0x468] sm:$0xf]  ;;  %v2398_v62 = vld [vmem:[#allocation2 + $0x58] sm:$0xf0] }
  0x81   :  { %v3565_v28 = vld [vmem:[#allocation2 + $0x334] sm:$0xf0]  ;;  %v2653_v31 = vor.u32 %v3537_v22, %v2652_v21  ;;  %v3519_v21 = vld [vmem:[#allocation2 + $0x1cc] sm:$0xf]  ;;  %v2590_v22 = vld [vmem:[#allocation2 + $0x1d8] sm:$0xf0] }
  0x82   :  { %1501 = vmatpush.bf16.msrb.mxu1 %v2445_v36  ;;  %1526 = vmatpush.bf16.msra.mxu0 %v2717_v41  ;;  %v3533_v36 = vld [vmem:[#allocation2 + $0x234] sm:$0xf0]  ;;  %v2765_v41 = vor.u32 %v3565_v28, %v2764_v26  ;;  %v3068_v26 = vld [vmem:[#allocation2 + $0x588] sm:$0xf]  ;;  %v2449_v28 = vor.u32 %v3483_v17, %v2446_v20  ;;  %v2593_v30 = vor.u32 %v3519_v21, %v2590_v22  ;;  %v2734_v20 = vld [vmem:[#allocation2 + $0x2f8] sm:$0xf0] }
  0x83   :  { %v3052_v40 = vld [vmem:[#allocation2 + $0x568] sm:$0xf]  ;;  %v3587_v22 = vld [vmem:[#allocation2 + $0x3ec] sm:$0xf] }
  0x84   :  { %1539 = vmatpush.bf16.msra.mxu2 %v2845_v35  ;;  %1514 = vmatpush.bf16.msrb.mxu3 %v2573_v42  ;;  %v2636_v35 = vld [vmem:[#allocation2 + $0x228] sm:$0xf] }
  0x85   :  { %v3116_v42 = vld [vmem:[#allocation2 + $0x5e8] sm:$0xf]  ;;  %v2637_v47 = vor.u32 %v3533_v36, %v2636_v35  ;;  %v2574_v35 = vld [vmem:[#allocation2 + $0x1b8] sm:$0xf0] }
  0x86   :  { %1502 = vmatpush.bf16.msrb.mxu1 %v2429_v50  ;;  %1527 = vmatpush.bf16.msra.mxu0 %v2701_v55  ;;  %v2478_v50 = vld [vmem:[#allocation2 + $0xf8] sm:$0xf0]  ;;  %v2620_v55 = vld [vmem:[#allocation2 + $0x208] sm:$0xf]  ;;  %v3117_v58 = vor.u32 %v3653_v43, %v3116_v42  ;;  %v3475_v43 = vld [vmem:[#allocation2 + $0x6c] sm:$0xf]  ;;  %v2577_v44 = vor.u32 %v3515_v33, %v2574_v35 }
  0x87   :  { %v3004_v17 = vld [vmem:[#allocation2 + $0x508] sm:$0xf]  ;;  %v2718_v35 = vld [vmem:[#allocation2 + $0x2d8] sm:$0xf0] }
  0x88   :  { %1540 = vmatpush.bf16.msra.mxu2 %v2829_v49  ;;  %1515 = vmatpush.bf16.msrb.mxu3 %v2557_v56  ;;  %v3491_v49 = vld [vmem:[#allocation2 + $0xec] sm:$0xf]  ;;  %v3529_v56 = vld [vmem:[#allocation2 + $0x214] sm:$0xf0] }
  0x89   :  { %3139 = vmatmul.msk.bf16.vlgmr.msrb.gmra.mxu0 %vm1313_vm0, %v3959_v48  ;;  %v2481_v2 = vor.u32 %v3491_v49, %v2478_v50  ;;  %v2621_v3 = vor.u32 %v3529_v56, %v2620_v55  ;;  %v2558_v49 = vld [vmem:[#allocation2 + $0x198] sm:$0xf0]  ;;  %v3633_v55 = vld [vmem:[#allocation2 + $0x554] sm:$0xf0]  ;;  %v2417_v56 = vor.u32 %v3475_v43, %v2414_v46  ;;  %v3615_v43 = vld [vmem:[#allocation2 + $0x4cc] sm:$0xf] }
  0x8a   :  { %1503 = vmatpush.bf16.msrb.mxu1 %v2413_v1  ;;  %1528 = vmatpush.bf16.msra.mxu0 %v2685_v5  ;;  %v3649_v1 = vld [vmem:[#allocation2 + $0x5d4] sm:$0xf0]  ;;  %v2973_v5 = vor.u32 %v3617_v59, %v2972_v54  ;;  %v3036_v54 = vld [vmem:[#allocation2 + $0x548] sm:$0xf]  ;;  %v2974_v46 = vld [vmem:[#allocation2 + $0x4d8] sm:$0xf0] }
  0x8c   :  { %1541 = vmatpush.bf16.msra.mxu2 %v2813_v0  ;;  %1516 = vmatpush.bf16.msrb.mxu3 %v2541_v7  ;;  %v3100_v0 = vld [vmem:[#allocation2 + $0x5c8] sm:$0xf]  ;;  %v2462_v7 = vld [vmem:[#allocation2 + $0xd8] sm:$0xf0] }
  0x8d   :  { %v3101_v11 = vor.u32 %v3649_v1, %v3100_v0  ;;  %v2465_v16 = vor.u32 %v3487_v4, %v2462_v7  ;;  %v2542_v0 = vld [vmem:[#allocation2 + $0x178] sm:$0xf0]  ;;  %v3037_v1 = vor.u32 %v3633_v55, %v3036_v54  ;;  %v3020_v4 = vld [vmem:[#allocation2 + $0x528] sm:$0xf] }
  0x8e   :  { %1504 = vmatpush.bf16.msrb.mxu1 %v2397_v14  ;;  %1529 = vmatpush.bf16.msra.mxu0 %v2669_v18  ;;  %v3084_v14 = vld [vmem:[#allocation2 + $0x5a8] sm:$0xf]  ;;  %v2609_v18 = vor.u32 %v3523_v9, %v2606_v10  ;;  %v2494_v54 = vld [vmem:[#allocation2 + $0x118] sm:$0xf0] }
  0x8f   :  { %v3085_v23 = vor.u32 %v3645_v15, %v3084_v14  ;;  %v2876_v15 = vld [vmem:[#allocation2 + $0x408] sm:$0xf]  ;;  %v2830_v55 = vld [vmem:[#allocation2 + $0x3b8] sm:$0xf0] }
  0x90   :  { %1542 = vmatpush.bf16.msra.mxu2 %v2797_v13  ;;  %1517 = vmatpush.bf16.msrb.mxu3 %v2525_v19  ;;  %v3613_v13 = vld [vmem:[#allocation2 + $0x4b4] sm:$0xf0] }
  0x91   :  { %v2957_v19 = vor.u32 %v3613_v13, %v2956_v12  ;;  %v3503_v12 = vld [vmem:[#allocation2 + $0x14c] sm:$0xf]  ;;  %v2526_v13 = vld [vmem:[#allocation2 + $0x158] sm:$0xf0] }
  0x92   :  { %1505 = vmatpush.bf16.msrb.mxu1 %v2381_v27  ;;  %1530 = vmatpush.bf16.msra.mxu0 %v2653_v31  ;;  %v3641_v27 = vld [vmem:[#allocation2 + $0x594] sm:$0xf0] }
  0x93   :  { %v3069_v36 = vor.u32 %v3641_v27, %v3068_v26  ;;  %v3463_v26 = vld [vmem:[#allocation2 + $0xc] sm:$0xf]  ;;  %v2366_v27 = vld [vmem:[#allocation2 + $0x18] sm:$0xf0] }
  0x94   :  { %1543 = vmatpush.bf16.msra.mxu2 %v2781_v25  ;;  %1518 = vmatpush.bf16.msrb.mxu3 %v2509_v32  ;;  %v3609_v25 = vld [vmem:[#allocation2 + $0x494] sm:$0xf0]  ;;  %v2430_v32 = vld [vmem:[#allocation2 + $0x98] sm:$0xf0] }
  0x95   :  { %v2941_v31 = vor.u32 %v3609_v25, %v2940_v24  ;;  %v2433_v42 = vor.u32 %v3479_v29, %v2430_v32  ;;  %v2529_v24 = vor.u32 %v3503_v12, %v2526_v13  ;;  %v3551_v32 = vld [vmem:[#allocation2 + $0x2cc] sm:$0xf]  ;;  %v2942_v13 = vld [vmem:[#allocation2 + $0x498] sm:$0xf0] }
  0x96   :  { %1506 = vmatpush.bf16.msrb.mxu1 %v2365_v45  ;;  %1531 = vmatpush.bf16.msra.mxu0 %v2637_v47  ;;  %v2925_v45 = vor.u32 %v3605_v38, %v2924_v37  ;;  %v3511_v47 = vld [vmem:[#allocation2 + $0x18c] sm:$0xf]  ;;  %v2510_v37 = vld [vmem:[#allocation2 + $0x138] sm:$0xf0]  ;;  %v2369_v38 = vor.u32 %v3463_v26, %v2366_v27 }
  0x97   :  { %v2561_v59 = vor.u32 %v3511_v47, %v2558_v49  ;;  %v3547_v47 = vld [vmem:[#allocation2 + $0x2ac] sm:$0xf]  ;;  %v2702_v49 = vld [vmem:[#allocation2 + $0x2b8] sm:$0xf0] }
  0x98   :  { %1544 = vmatpush.bf16.msra.mxu2 %v2765_v41  ;;  %1519 = vmatpush.bf16.msrb.mxu3 %v2493_v51  ;;  %v3637_v41 = vld [vmem:[#allocation2 + $0x574] sm:$0xf0]  ;;  %v2908_v51 = vld [vmem:[#allocation2 + $0x448] sm:$0xf]  ;;  %v3607_v12 = vld [vmem:[#allocation2 + $0x48c] sm:$0xf] }
  0x99   :  { %1507 = vmatmul.bf16.vlgmr.msrb.gmra.mxu1 %v3946_v57  ;;  %v3053_v50 = vor.u32 %v3637_v41, %v3052_v40  ;;  %v3583_v40 = vld [vmem:[#allocation2 + $0x3cc] sm:$0xf]  ;;  %v2846_v41 = vld [vmem:[#allocation2 + $0x3d8] sm:$0xf0] }
  0x9a   :  { %1551 = vmatpush.bf16.msra.mxu1 %v2989_v52  ;;  %1532 = vmatpush.bf16.msra.mxu0 %v2621_v3  ;;  %v3601_v52 = vld [vmem:[#allocation2 + $0x454] sm:$0xf0] }
  0x9b   :  { %1520 = vmatmul.bf16.vlgmr.msrb.gmra.mxu3 %v3952_v6  ;;  %v2909_v61 = vor.u32 %v3601_v52, %v2908_v51  ;;  %v3597_v3 = vld [vmem:[#allocation2 + $0x434] sm:$0xf0]  ;;  %v3579_v51 = vld [vmem:[#allocation2 + $0x3ac] sm:$0xf] }
  0x9c   :  { %1564 = vmatpush.bf16.msra.mxu3 %v3117_v58  ;;  %1545 = vmatpush.bf16.msra.mxu2 %v2749_v63  ;;  %v3471_v58 = vld [vmem:[#allocation2 + $0x4c] sm:$0xf] }
  0x9d   :  { %1533 = vmatmul.bf16.vlgmr.msra.gmra.mxu0 %v3944_v53  ;;  %v3507_v63 = vld [vmem:[#allocation2 + $0x16c] sm:$0xf]  ;;  %v2401_v7 = vor.u32 %v3471_v58, %v2398_v62  ;;  %v3118_v58 = vld [vmem:[#allocation2 + $0x5f8] sm:$0xf0] }
  0x9e   :  { %1552 = vmatpush.bf16.msra.mxu1 %v2973_v5  ;;  %1584 = vmatpush.bf16.msrb.mxu0 %v3133_v8  ;;  %v3629_v5 = vld [vmem:[#allocation2 + $0x534] sm:$0xf0]  ;;  %v3467_v8 = vld [vmem:[#allocation2 + $0x2c] sm:$0xf]  ;;  %v2545_v9 = vor.u32 %v3507_v63, %v2542_v0  ;;  %v2958_v0 = vld [vmem:[#allocation2 + $0x4b8] sm:$0xf0] }
  0x9f   :  { %1546 = vmatmul.bf16.vlgmr.msra.gmra.mxu2 %v3948_v60  ;;  %v3021_v14 = vor.u32 %v3629_v5, %v3020_v4  ;;  %v3495_v52 = vld [vmem:[#allocation2 + $0x10c] sm:$0xf]  ;;  %v2686_v4 = vld [vmem:[#allocation2 + $0x298] sm:$0xf0] }
  0xa0   :  { %1590 = vmatpush.bf16.msrb.mxu2 %v2481_v2  ;;  %1565 = vmatpush.bf16.msra.mxu3 %v3101_v11  ;;  %v2892_v2 = vld [vmem:[#allocation2 + $0x428] sm:$0xf]  ;;  %v2382_v11 = vld [vmem:[#allocation2 + $0x38] sm:$0xf0]  ;;  %v2497_v62 = vor.u32 %v3495_v52, %v2494_v54  ;;  %v3611_v63 = vld [vmem:[#allocation2 + $0x4ac] sm:$0xf] }
  0xa1   :  { %v2893_v10 = vor.u32 %v3597_v3, %v2892_v2  ;;  %v2385_v21 = vor.u32 %v3467_v8, %v2382_v11  ;;  %v3543_v3 = vld [vmem:[#allocation2 + $0x28c] sm:$0xf]  ;;  %v3998_v54 = vld [vmem:[#allocation4] sm:$0xf] }
  0xa2   :  { %1603 = vmatpush.bf16.msra.mxu0 %v2609_v18  ;;  %1553 = vmatpush.bf16.msra.mxu1 %v2957_v19  ;;  %v3625_v18 = vld [vmem:[#allocation2 + $0x514] sm:$0xf0]  ;;  %v3555_v19 = vld [vmem:[#allocation2 + $0x2ec] sm:$0xf]  ;;  %v2689_v11 = vor.u32 %v3543_v3, %v2686_v4  ;;  %v3038_v4 = vld [vmem:[#allocation2 + $0x558] sm:$0xf0] }
  0xa3   :  { %v2737_v29 = vor.u32 %v3555_v19, %v2734_v20  ;;  %v3575_v5 = vld [vmem:[#allocation2 + $0x38c] sm:$0xf]  ;;  %v2798_v19 = vld [vmem:[#allocation2 + $0x378] sm:$0xf0] }
  0xa4   :  { %1591 = vmatpush.bf16.msrb.mxu2 %v2465_v16  ;;  %1566 = vmatpush.bf16.msra.mxu3 %v3085_v23  ;;  %v3593_v16 = vld [vmem:[#allocation2 + $0x414] sm:$0xf0]  ;;  %v2862_v23 = vld [vmem:[#allocation2 + $0x3f8] sm:$0xf0]  ;;  %v3647_v8 = vld [vmem:[#allocation2 + $0x5cc] sm:$0xf] }
  0xa5   :  { %v2877_v25 = vor.u32 %v3593_v16, %v2876_v15  ;;  %v2865_v33 = vor.u32 %v3587_v22, %v2862_v23  ;;  %v3539_v16 = vld [vmem:[#allocation2 + $0x26c] sm:$0xf]  ;;  %v2945_v22 = vor.u32 %v3607_v12, %v2942_v13 }
  0xa6   :  { %1604 = vmatpush.bf16.msra.mxu0 %v2593_v30  ;;  %1554 = vmatpush.bf16.msra.mxu1 %v2941_v31  ;;  %v3619_v30 = vld [vmem:[#allocation2 + $0x4ec] sm:$0xf]  ;;  %v2990_v31 = vld [vmem:[#allocation2 + $0x4f8] sm:$0xf0] }
  0xa7   :  { %v3643_v20 = vld [vmem:[#allocation2 + $0x5ac] sm:$0xf] }
  0xa8   :  { %1592 = vmatpush.bf16.msrb.mxu2 %v2449_v28  ;;  %1567 = vmatpush.bf16.msra.mxu3 %v3069_v36  ;;  %v3005_v28 = vor.u32 %v3625_v18, %v3004_v17  ;;  %v3499_v36 = vld [vmem:[#allocation2 + $0x12c] sm:$0xf] }
  0xa9   :  { %v3571_v17 = vld [vmem:[#allocation2 + $0x36c] sm:$0xf] }
  0xaa   :  { %1605 = vmatpush.bf16.msra.mxu0 %v2577_v44  ;;  %1555 = vmatpush.bf16.msra.mxu1 %v2925_v45  ;;  %v2721_v44 = vor.u32 %v3551_v32, %v2718_v35  ;;  %v2513_v45 = vor.u32 %v3499_v36, %v2510_v37  ;;  %v2801_v26 = vor.u32 %v3571_v17, %v2798_v19  ;;  %v2782_v32 = vld [vmem:[#allocation2 + $0x358] sm:$0xf0]  ;;  %v3631_v3 = vld [vmem:[#allocation2 + $0x54c] sm:$0xf] }
  0xab   :  { %v3070_v35 = vld [vmem:[#allocation2 + $0x598] sm:$0xf0]  ;;  %v3591_v13 = vld [vmem:[#allocation2 + $0x40c] sm:$0xf] }
  0xac   :  { %1593 = vmatpush.bf16.msrb.mxu2 %v2433_v42  ;;  %1568 = vmatpush.bf16.msra.mxu3 %v3053_v50  ;;  %v2993_v42 = vor.u32 %v3619_v30, %v2990_v31  ;;  %v2849_v50 = vor.u32 %v3583_v40, %v2846_v41  ;;  %v3567_v30 = vld [vmem:[#allocation2 + $0x34c] sm:$0xf]  ;;  %v2910_v40 = vld [vmem:[#allocation2 + $0x458] sm:$0xf0] }
  0xad   :  { %3140 = vmatmul.msk.bf16.vlgmr.msrb.gmra.mxu0 %vm1313_vm0, %v3959_v48  ;;  %v3655_v17 = vld [vmem:[#allocation2 + $0x60c] sm:$0xf]  ;;  %v3134_v19 = vld [vmem:[#allocation2 + $0x618] sm:$0xf0] }
  0xae   :  { %1606 = vmatpush.bf16.msra.mxu0 %v2561_v59  ;;  %1556 = vmatpush.bf16.msra.mxu1 %v2909_v61  ;;  %v2977_v59 = vor.u32 %v3615_v43, %v2974_v46  ;;  %v2705_v61 = vor.u32 %v3547_v47, %v2702_v49  ;;  %v3563_v46 = vld [vmem:[#allocation2 + $0x32c] sm:$0xf]  ;;  %v2766_v47 = vld [vmem:[#allocation2 + $0x338] sm:$0xf0] }
  0xaf   :  { %v3635_v49 = vld [vmem:[#allocation2 + $0x56c] sm:$0xf] }
  0xb0   :  { %1594 = vmatpush.bf16.msrb.mxu2 %v2417_v56  ;;  %1569 = vmatpush.bf16.msra.mxu3 %v3037_v1  ;;  %v3651_v56 = vld [vmem:[#allocation2 + $0x5ec] sm:$0xf]  ;;  %v2833_v1 = vor.u32 %v3579_v51, %v2830_v55 }
  0xb1   :  { %v3121_v2 = vor.u32 %v3651_v56, %v3118_v58  ;;  %v3595_v56 = vld [vmem:[#allocation2 + $0x42c] sm:$0xf]  ;;  %v2894_v58 = vld [vmem:[#allocation2 + $0x438] sm:$0xf0] }
  0xb2   :  { %1607 = vmatpush.bf16.msra.mxu0 %v2545_v9  ;;  %1557 = vmatpush.bf16.msra.mxu1 %v2893_v10  ;;  %v3102_v9 = vld [vmem:[#allocation2 + $0x5d8] sm:$0xf0]  ;;  %v2961_v10 = vor.u32 %v3611_v63, %v2958_v0  ;;  %v3559_v0 = vld [vmem:[#allocation2 + $0x30c] sm:$0xf] }
  0xb3   :  { %v3105_v15 = vor.u32 %v3647_v8, %v3102_v9  ;;  %v2622_v63 = vld [vmem:[#allocation2 + $0x218] sm:$0xf0]  ;;  %v3673_v8 = vld [vmem:[%s4408_s3 + $0x74] sm:$0xf0]  ;;  %v3264_v9 = vld [vmem:[%s4408_s3 + $0xf0] sm:$0xf] }
  0xb4   :  { %1595 = vmatpush.bf16.msrb.mxu2 %v2401_v7  ;;  %1570 = vmatpush.bf16.msra.mxu3 %v3021_v14  ;;  %v2814_v7 = vld [vmem:[#allocation2 + $0x398] sm:$0xf0] }
  0xb5   :  { %v2817_v14 = vor.u32 %v3575_v5, %v2814_v7  ;;  %v2897_v7 = vor.u32 %v3595_v56, %v2894_v58  ;;  %v3665_v56 = vld [vmem:[%s4408_s3 + $0x34] sm:$0xf0] }
  0xb6   :  { %1608 = vmatpush.bf16.msra.mxu0 %v2529_v24  ;;  %1558 = vmatpush.bf16.msra.mxu1 %v2877_v25  ;;  %v3603_v24 = vld [vmem:[#allocation2 + $0x46c] sm:$0xf]  ;;  %v2926_v25 = vld [vmem:[#allocation2 + $0x478] sm:$0xf0] }
  0xb7   :  { %v2929_v36 = vor.u32 %v3603_v24, %v2926_v25 }
  0xb8   :  { %1596 = vmatpush.bf16.msrb.mxu2 %v2385_v21  ;;  %1571 = vmatpush.bf16.msra.mxu3 %v3005_v28  ;;  %v3086_v21 = vld [vmem:[#allocation2 + $0x5b8] sm:$0xf0]  ;;  %v3535_v28 = vld [vmem:[#allocation2 + $0x24c] sm:$0xf] }
  0xb9   :  { %1559 = vmatmul.bf16.vlgmr.msra.gmra.mxu1 %v3966_v34  ;;  %v3089_v27 = vor.u32 %v3643_v20, %v3086_v21 }
  0xba   :  { %1616 = vmatpush.bf16.msrb.mxu1 %v2737_v29  ;;  %1609 = vmatpush.bf16.msra.mxu0 %v2513_v45  ;;  %v3989_v18 = vpop.f32.mrf.mxu0  ;;  %v2654_v29 = vld [vmem:[#allocation2 + $0x258] sm:$0xf0]  ;;  %v3992_v31 = vpop.f32.mrf.mxu1 }
  0xbb   :  { %1572 = vmatmul.bf16.vlgmr.msra.gmra.mxu3 %v3968_v39  ;;  %v2657_v37 = vor.u32 %v3535_v28, %v2654_v29  ;;  %v2638_v45 = vld [vmem:[#allocation2 + $0x238] sm:$0xf0]  ;;  %v3137_v28 = vor.u32 %v3655_v17, %v3134_v19  ;;  %v3256_v29 = vld [vmem:[%s4408_s3 + $0xe0] sm:$0xf] }
  0xbc   :  { %1629 = vmatpush.bf16.msrb.mxu3 %v2865_v33  ;;  %1597 = vmatpush.bf16.msrb.mxu2 %v2369_v38  ;;  %v3639_v33 = vld [vmem:[#allocation2 + $0x58c] sm:$0xf]  ;;  %v3144_v19 = vld [vmem:[%s4408_s3] sm:$0xf] }
  0xbd   :  { %v3599_v38 = vld [vmem:[#allocation2 + $0x44c] sm:$0xf]  ;;  %v3073_v43 = vor.u32 %v3639_v33, %v3070_v35 }
  0xbe   :  { %1617 = vmatpush.bf16.msrb.mxu1 %v2721_v44  ;;  %1610 = vmatpush.bf16.msra.mxu0 %v2497_v62  ;;  %v3996_v41 = vpop.f32.mrf.mxu3  ;;  %v3531_v44 = vld [vmem:[#allocation2 + $0x22c] sm:$0xf]  ;;  %v2913_v52 = vor.u32 %v3599_v38, %v2910_v40  ;;  %v3184_v38 = vld [vmem:[%s4408_s3 + $0x50] sm:$0xf]  ;;  %v3669_v40 = vld [vmem:[%s4408_s3 + $0x54] sm:$0xf0] }
  0xbf   :  { %1598 = vmatmul.bf16.vlgmr.msrb.gmra.mxu2 %v3946_v57  ;;  %v2670_v57 = vld [vmem:[#allocation2 + $0x278] sm:$0xf0]  ;;  %v2641_v55 = vor.u32 %v3531_v44, %v2638_v45 }
  0xc0   :  { %1642 = vmatpush.bf16.msra.mxu2 %v2993_v42  ;;  %1630 = vmatpush.bf16.msrb.mxu3 %v2849_v50  ;;  %v2673_v23 = vor.u32 %v3539_v16, %v2670_v57  ;;  %v2785_v42 = vor.u32 %v3567_v30, %v2782_v32  ;;  %v3054_v50 = vld [vmem:[#allocation2 + $0x578] sm:$0xf0]  ;;  %v3041_v57 = vor.u32 %v3631_v3, %v3038_v4  ;;  %v3687_v30 = vld [vmem:[%s4408_s3 + $0xe4] sm:$0xf0]  ;;  %v3224_v4 = vld [vmem:[%s4408_s3 + $0xa0] sm:$0xf] }
  0xc1   :  { %1611 = vmatmul.bf16.vlgmr.msra.gmra.mxu0 %v3952_v6  ;;  %v3994_v6 = vpop.f32.mrf.mxu2  ;;  %v3057_v62 = vor.u32 %v3635_v49, %v3054_v50  ;;  %v3683_v50 = vld [vmem:[%s4408_s3 + $0xc4] sm:$0xf0] }
  0xc2   :  { %1618 = vmatpush.bf16.msrb.mxu1 %v2705_v61  ;;  %1655 = vmatpush.bf16.msrb.mxu0 %v3121_v2  ;;  %v1328_v51 = vpop.f32.mrf.mxu0  ;;  %v2769_v61 = vor.u32 %v3563_v46, %v2766_v47  ;;  %v3200_v2 = vld [vmem:[%s4408_s3 + $0x70] sm:$0xf]  ;;  %v1341_v5 = vpop.f32.mrf.mxu1  ;;  %v3185_v46 = vor.u32 %v3669_v40, %v3184_v38  ;;  %v3667_v47 = vld [vmem:[%s4408_s3 + $0x44] sm:$0xf0]  ;;  %v3686_v38 = vld [vmem:[%s4408_s3 + $0xe4] sm:$0xf] }
  0xc3   :  { %v3201_v21 = vor.u32 %v3673_v8, %v3200_v2  ;;  %v3160_v2 = vld [vmem:[%s4408_s3 + $0x20] sm:$0xf]  ;;  %v3152_v8 = vld [vmem:[%s4408_s3 + $0x10] sm:$0xf]  ;;  %v3258_v40 = vld [vmem:[%s4408_s3 + $0xe8] sm:$0xf0] }
  0xc4   :  { %1643 = vmatpush.bf16.msra.mxu2 %v2977_v59  ;;  %1631 = vmatpush.bf16.msrb.mxu3 %v2833_v1  ;;  %v3527_v59 = vld [vmem:[#allocation2 + $0x20c] sm:$0xf]  ;;  %v2750_v1 = vld [vmem:[#allocation2 + $0x318] sm:$0xf0] }
  0xc5   :  { %v2625_v12 = vor.u32 %v3527_v59, %v2622_v63  ;;  %v2753_v16 = vor.u32 %v3559_v0, %v2750_v1 }
  0xc6   :  { %1619 = vmatpush.bf16.msrb.mxu1 %v2689_v11  ;;  %1656 = vmatpush.bf16.msrb.mxu0 %v3105_v15  ;;  %v301_v15 = vperm.slane %v3998_v54, 0  ;;  %v1367_v20 = vpop.f32.mrf.mxu3 }
  0xc7   :  { %v3659_v20 = vld [vmem:[%s4408_s3 + $0x4] sm:$0xf0] }
  0xc8   :  { %1644 = vmatpush.bf16.msra.mxu2 %v2961_v10  ;;  %1632 = vmatpush.bf16.msrb.mxu3 %v2817_v14  ;;  %v3689_v10 = vld [vmem:[%s4408_s3 + $0xf4] sm:$0xf0]  ;;  %v2878_v14 = vld [vmem:[#allocation2 + $0x418] sm:$0xf0]  ;;  %v1327_v32 = vadd.f32 %v3989_v18, %v301_v15  ;;  %v3257_v18 = vor.u32 %v3687_v30, %v3256_v29 }
  0xc9   :  { %v1354_v11 = vpop.f32.mrf.mxu2  ;;  %v3265_v24 = vor.u32 %v3689_v10, %v3264_v9  ;;  %v2881_v25 = vor.u32 %v3591_v13, %v2878_v14  ;;  %v3661_v9 = vld [vmem:[%s4408_s3 + $0x14] sm:$0xf0]  ;;  %v3216_v14 = vld [vmem:[%s4408_s3 + $0x90] sm:$0xf] }
  0xca   :  { %1620 = vmatpush.bf16.msrb.mxu1 %v2673_v23  ;;  %1657 = vmatpush.bf16.msrb.mxu0 %v3089_v27  ;;  %v3022_v23 = vld [vmem:[#allocation2 + $0x538] sm:$0xf0]  ;;  %v3671_v27 = vld [vmem:[%s4408_s3 + $0x64] sm:$0xf0]  ;;  %v1340_v44 = vadd.f32 %v3992_v31, %v1327_v32  ;;  %v3240_v31 = vld [vmem:[%s4408_s3 + $0xc0] sm:$0xf] }
  0xcb   :  { %v3241_v58 = vor.u32 %v3683_v50, %v3240_v31  ;;  %v3677_v15 = vld [vmem:[%s4408_s3 + $0x94] sm:$0xf0] }
  0xcc   :  { %1645 = vmatpush.bf16.msra.mxu2 %v2945_v22  ;;  %1633 = vmatpush.bf16.msrb.mxu3 %v2801_v26  ;;  %v3627_v22 = vld [vmem:[#allocation2 + $0x52c] sm:$0xf]  ;;  %v3192_v26 = vld [vmem:[%s4408_s3 + $0x60] sm:$0xf] }
  0xcd   :  { %v3025_v33 = vor.u32 %v3627_v22, %v3022_v23  ;;  %v3193_v35 = vor.u32 %v3671_v27, %v3192_v26  ;;  %v3217_v22 = vor.u32 %v3677_v15, %v3216_v14  ;;  %v3208_v23 = vld [vmem:[%s4408_s3 + $0x80] sm:$0xf]  ;;  %v3266_v26 = vld [vmem:[%s4408_s3 + $0xf8] sm:$0xf0]  ;;  %v3145_v27 = vor.u32 %v3659_v20, %v3144_v19  ;;  %v3678_v14 = vld [vmem:[%s4408_s3 + $0xa4] sm:$0xf] }
  0xce   :  { %1621 = vmatpush.bf16.msrb.mxu1 %v2657_v37  ;;  %1658 = vmatpush.bf16.msrb.mxu0 %v3073_v43  ;;  %v3006_v37 = vld [vmem:[#allocation2 + $0x518] sm:$0xf0]  ;;  %v3248_v43 = vld [vmem:[%s4408_s3 + $0xd0] sm:$0xf]  ;;  %v3226_v15 = vld [vmem:[%s4408_s3 + $0xa8] sm:$0xf0] }
  0xcf   :  { %v3154_v19 = vld [vmem:[%s4408_s3 + $0x18] sm:$0xf0] }
  0xd0   :  { %1646 = vmatpush.bf16.msra.mxu2 %v2929_v36  ;;  %1634 = vmatpush.bf16.msrb.mxu3 %v2785_v42  ;;  %v3623_v36 = vld [vmem:[#allocation2 + $0x50c] sm:$0xf] }
  0xd1   :  { %v1404_v42 = vpop.f32.mrf.mxu2  ;;  %v3009_v45 = vor.u32 %v3623_v36, %v3006_v37 }
  0xd2   :  { %1622 = vmatpush.bf16.msrb.mxu1 %v2641_v55  ;;  %1659 = vmatpush.bf16.msrb.mxu0 %v3057_v62  ;;  %v3168_v55 = vld [vmem:[%s4408_s3 + $0x30] sm:$0xf]  ;;  %v3681_v62 = vld [vmem:[%s4408_s3 + $0xb4] sm:$0xf0] }
  0xd3   :  { %v3169_v0 = vor.u32 %v3665_v56, %v3168_v55  ;;  %v3666_v55 = vld [vmem:[%s4408_s3 + $0x44] sm:$0xf]  ;;  %v3178_v56 = vld [vmem:[%s4408_s3 + $0x48] sm:$0xf0] }
  0xd4   :  { %1647 = vmatpush.bf16.msra.mxu2 %v2913_v52  ;;  %1635 = vmatpush.bf16.msrb.mxu3 %v2769_v61 }
  0xd6   :  { %1623 = vmatpush.bf16.msrb.mxu1 %v2625_v12  ;;  %1660 = vmatpush.bf16.msrb.mxu0 %v3041_v57  ;;  %v1378_v52 = vpop.f32.mrf.mxu0  ;;  %v1391_v59 = vpop.f32.mrf.mxu1  ;;  %v3153_v57 = vor.u32 %v3661_v9, %v3152_v8 }
  0xd8   :  { %1648 = vmatpush.bf16.msra.mxu2 %v2897_v7  ;;  %1636 = vmatpush.bf16.msrb.mxu3 %v2753_v16 }
  0xd9   :  { %1624 = vmatmul.bf16.vlgmr.msrb.gmra.mxu1 %v3944_v53  ;;  %v3685_v53 = vld [vmem:[%s4408_s3 + $0xd4] sm:$0xf0]  ;;  %v1406_v61 = vpop.f32.mrf.mxu2 }
  0xda   :  { %2092 = vmatpush.bf16.msra.mxu1 %v3265_v24  ;;  %1661 = vmatpush.bf16.msrb.mxu0 %v3025_v33  ;;  %v3249_v49 = vor.u32 %v3685_v53, %v3248_v43  ;;  %v3675_v24 = vld [vmem:[%s4408_s3 + $0x84] sm:$0xf0]  ;;  %v3670_v33 = vld [vmem:[%s4408_s3 + $0x64] sm:$0xf]  ;;  %v3668_v53 = vld [vmem:[%s4408_s3 + $0x54] sm:$0xf] }
  0xdb   :  { %1637 = vmatmul.bf16.vlgmr.msrb.gmra.mxu3 %v3948_v60  ;;  %v3176_v60 = vld [vmem:[%s4408_s3 + $0x40] sm:$0xf]  ;;  %v3209_v32 = vor.u32 %v3675_v24, %v3208_v23  ;;  %v3699_v23 = vld [vmem:[%s4408_s3 + $0x144] sm:$0xf0] }
  0xdc   :  { %2079 = vmatpush.bf16.msra.mxu3 %v3201_v21  ;;  %1649 = vmatpush.bf16.msra.mxu2 %v2881_v25  ;;  %v3177_v51 = vor.u32 %v3667_v47, %v3176_v60  ;;  %v3672_v21 = vld [vmem:[%s4408_s3 + $0x74] sm:$0xf]  ;;  %v3250_v47 = vld [vmem:[%s4408_s3 + $0xd8] sm:$0xf0] }
  0xdd   :  { %v3688_v25 = vld [vmem:[%s4408_s3 + $0xf4] sm:$0xf] }
  0xde   :  { %2093 = vmatpush.bf16.msra.mxu1 %v3257_v18  ;;  %1662 = vmatpush.bf16.msrb.mxu0 %v3009_v45  ;;  %v1380_v10 = vpop.f32.mrf.mxu0  ;;  %v1417_v11 = vpop.f32.mrf.mxu3  ;;  %v3269_v36 = vor.u32 %v3688_v25, %v3266_v26  ;;  %v302_v18 = vperm.slane %v3998_v54, 1  ;;  %v3261_v45 = vor.u32 %v3686_v38, %v3258_v40  ;;  %v3684_v60 = vld [vmem:[%s4408_s3 + $0xd4] sm:$0xf]  ;;  %v3218_v25 = vld [vmem:[%s4408_s3 + $0x98] sm:$0xf0] }
  0xdf   :  { %1650 = vmatmul.bf16.vlgmr.msra.gmra.mxu2 %v3966_v34  ;;  %v1353_v34 = vadd.f32 %v3994_v6, %v1340_v44  ;;  %v3232_v6 = vld [vmem:[%s4408_s3 + $0xb0] sm:$0xf]  ;;  %v1393_v13 = vpop.f32.mrf.mxu1  ;;  %v3186_v44 = vld [vmem:[%s4408_s3 + $0x58] sm:$0xf0]  ;;  %v3662_v10 = vld [vmem:[%s4408_s3 + $0x24] sm:$0xf] }
  0xe0   :  { %1675 = vmatpush.bf16.msrb.mxu2 %v3137_v28  ;;  %2080 = vmatpush.bf16.msra.mxu3 %v3193_v35  ;;  %v3233_v3 = vor.u32 %v3681_v62, %v3232_v6  ;;  %v3194_v35 = vld [vmem:[%s4408_s3 + $0x68] sm:$0xf0]  ;;  %v1418_v31 = vadd.f32 %v1417_v11, %v302_v18  ;;  %v3312_v62 = vld [vmem:[%s4408_s3 + $0x150] sm:$0xf]  ;;  %v3288_v38 = vld [vmem:[%s4408_s3 + $0x120] sm:$0xf] }
  0xe1   :  { %1663 = vmatmul.bf16.vlgmr.msrb.gmra.mxu0 %v3968_v39  ;;  %v1366_v63 = vadd.f32 %v3996_v41, %v1353_v34  ;;  %v3663_v39 = vld [vmem:[%s4408_s3 + $0x24] sm:$0xf0]  ;;  %v3197_v43 = vor.u32 %v3670_v33, %v3194_v35  ;;  %v3320_v34 = vld [vmem:[%s4408_s3 + $0x160] sm:$0xf]  ;;  %v3242_v6 = vld [vmem:[%s4408_s3 + $0xc8] sm:$0xf0] }
  0xe2   :  { %2094 = vmatpush.bf16.msra.mxu1 %v3249_v49  ;;  %v3679_v41 = vld [vmem:[%s4408_s3 + $0xa4] sm:$0xf0]  ;;  %v3161_v5 = vor.u32 %v3663_v39, %v3160_v2  ;;  %v1430_v16 = vpop.f32.mrf.mxu2  ;;  %v3705_v49 = vld [vmem:[%s4408_s3 + $0x174] sm:$0xf0]  ;;  %v3664_v2 = vld [vmem:[%s4408_s3 + $0x34] sm:$0xf] }
  0xe3   :  { %v1379_v1 = vadd.f32 %v1378_v52, %v1366_v63  ;;  %v3225_v12 = vor.u32 %v3679_v41, %v3224_v4  ;;  %v3189_v52 = vor.u32 %v3668_v53, %v3186_v44  ;;  %v3701_v63 = vld [vmem:[%s4408_s3 + $0x154] sm:$0xf0]  ;;  %v3170_v39 = vld [vmem:[%s4408_s3 + $0x38] sm:$0xf0]  ;;  %v3162_v11 = vld [vmem:[%s4408_s3 + $0x28] sm:$0xf0] }
  0xe4   :  { %2081 = vmatpush.bf16.msra.mxu3 %v3185_v46  ;;  %v3328_v46 = vld [vmem:[%s4408_s3 + $0x170] sm:$0xf]  ;;  %v3313_v4 = vor.u32 %v3701_v63, %v3312_v62  ;;  %v3173_v9 = vor.u32 %v3664_v2, %v3170_v39  ;;  %v3658_v33 = vld [vmem:[%s4408_s3 + $0x4] sm:$0xf]  ;;  %v3695_v40 = vld [vmem:[%s4408_s3 + $0x124] sm:$0xf0] }
  0xe5   :  { %v1392_v7 = vadd.f32 %v1391_v59, %v1379_v1  ;;  %v3329_v50 = vor.u32 %v3705_v49, %v3328_v46  ;;  %v3682_v59 = vld [vmem:[%s4408_s3 + $0xc4] sm:$0xf]  ;;  %v3181_v1 = vor.u32 %v3666_v55, %v3178_v56  ;;  %v3210_v53 = vld [vmem:[%s4408_s3 + $0x88] sm:$0xf0]  ;;  %v3289_v46 = vor.u32 %v3695_v40, %v3288_v38  ;;  %v3280_v49 = vld [vmem:[%s4408_s3 + $0x110] sm:$0xf] }
  0xe6   :  { %2095 = vmatpush.bf16.msra.mxu1 %v3241_v58  ;;  %v1419_v30 = vpop.f32.mrf.mxu3  ;;  %v3253_v58 = vor.u32 %v3684_v60, %v3250_v47  ;;  %v3272_v56 = vld [vmem:[%s4408_s3 + $0x100] sm:$0xf]  ;;  %v3704_v62 = vld [vmem:[%s4408_s3 + $0x174] sm:$0xf]  ;;  %v3330_v63 = vld [vmem:[%s4408_s3 + $0x178] sm:$0xf0] }
  0xe7   :  { %v1405_v17 = vadd.f32 %v1404_v42, %v1392_v7  ;;  %2105 = vmatpush.bf16.msra.mxu2 %v3329_v50  ;;  %v3234_v7 = vld [vmem:[%s4408_s3 + $0xb8] sm:$0xf0] }
  0xe8   :  { %2082 = vmatpush.bf16.msra.mxu3 %v3177_v51  ;;  %v3703_v51 = vld [vmem:[%s4408_s3 + $0x164] sm:$0xf0] }
  0xe9   :  { %v1681_v28 = vmax.f32 %v1405_v17, 0.0  ;;  %v3321_v61 = vor.u32 %v3703_v51, %v3320_v34  ;;  %v3660_v17 = vld [vmem:[%s4408_s3 + $0x14] sm:$0xf] }
  0xea   :  { %2096 = vmatpush.bf16.msra.mxu1 %v3233_v3  ;;  %v1432_v37 = vpop.f32.mrf.mxu2  ;;  %v3245_v3 = vor.u32 %v3682_v59, %v3242_v6 }
  0xeb   :  { %v4132_v42 = vpack.c.bf16 %v1681_v28, %v1681_v28  ;;  %2106 = vmatpush.bf16.msra.mxu2 %v3321_v61  ;;  %v3697_v28 = vld [vmem:[%s4408_s3 + $0x134] sm:$0xf0] }
  0xec   :  { %2083 = vmatpush.bf16.msra.mxu3 %v3169_v0  ;;  %v1431_v0 = vadd.f32 %v1430_v16, %v1418_v31  ;;  %v3693_v31 = vld [vmem:[%s4408_s3 + $0x114] sm:$0xf0] }
  0xee   :  { %2097 = vmatpush.bf16.msra.mxu1 %v3225_v12 }
  0xef   :  { %3141 = vmatmul.msk.bf16.vlgmr.msrb.gmra.mxu2 %vm1313_vm0, %v3959_v48  ;;  %v3202_v48 = vld [vmem:[%s4408_s3 + $0x78] sm:$0xf0] }
  0xf0   :  { %2084 = vmatpush.bf16.msra.mxu3 %v3161_v5  ;;  %v3205_v29 = vor.u32 %v3672_v21, %v3202_v48  ;;  %v3680_v5 = vld [vmem:[%s4408_s3 + $0xb4] sm:$0xf]  ;;  %2107 = vmatpush.bf16.msra.mxu2 %v3313_v4  ;;  %v3229_v21 = vor.u32 %v3678_v14, %v3226_v15  ;;  %v3304_v48 = vld [vmem:[%s4408_s3 + $0x140] sm:$0xf]  ;;  %v3314_v4 = vld [vmem:[%s4408_s3 + $0x158] sm:$0xf0] }
  0xf1   :  { %v3237_v12 = vor.u32 %v3680_v5, %v3234_v7  ;;  %v3305_v26 = vor.u32 %v3699_v23, %v3304_v48  ;;  %v3698_v7 = vld [vmem:[%s4408_s3 + $0x144] sm:$0xf]  ;;  %v3298_v14 = vld [vmem:[%s4408_s3 + $0x138] sm:$0xf0]  ;;  %v3719_v23 = vld [vmem:[%s4408_s3 + $0x1e4] sm:$0xf0] }
  0xf2   :  { %2098 = vmatpush.bf16.msra.mxu1 %v3217_v22  ;;  %v3676_v22 = vld [vmem:[%s4408_s3 + $0x94] sm:$0xf] }
  0xf3   :  { %v3221_v37 = vor.u32 %v3676_v22, %v3218_v25  ;;  %v3384_v22 = vld [vmem:[%s4408_s3 + $0x1e0] sm:$0xf]  ;;  %v3692_v25 = vld [vmem:[%s4408_s3 + $0x114] sm:$0xf] }
  0xf4   :  { %2085 = vmatpush.bf16.msra.mxu3 %v3153_v57  ;;  %v3165_v57 = vor.u32 %v3662_v10, %v3162_v11  ;;  %2108 = vmatpush.bf16.msra.mxu2 %v3305_v26  ;;  %v3282_v26 = vld [vmem:[%s4408_s3 + $0x118] sm:$0xf0] }
  0xf6   :  { %2099 = vmatpush.bf16.msra.mxu1 %v3209_v32  ;;  %v1443_v41 = vpop.f32.mrf.mxu0  ;;  %v1456_v13 = vpop.f32.mrf.mxu1  ;;  %v3157_v32 = vor.u32 %v3660_v17, %v3154_v19  ;;  %v3721_v17 = vld [vmem:[%s4408_s3 + $0x1f4] sm:$0xf0] }
  0xf7   :  { %v1444_v8 = vadd.f32 %v1443_v41, %v1431_v0  ;;  %v3333_v0 = vor.u32 %v3704_v62, %v3330_v63 }
  0xf8   :  { %2086 = vmatpush.bf16.msra.mxu3 %v3145_v27  ;;  %v3296_v27 = vld [vmem:[%s4408_s3 + $0x130] sm:$0xf] }
  0xf9   :  { %v1457_v16 = vadd.f32 %v1456_v13, %v1444_v8  ;;  %v3297_v35 = vor.u32 %v3697_v28, %v3296_v27  ;;  %v3306_v8 = vld [vmem:[%s4408_s3 + $0x148] sm:$0xf0]  ;;  %v3696_v13 = vld [vmem:[%s4408_s3 + $0x134] sm:$0xf]  ;;  %v3376_v27 = vld [vmem:[%s4408_s3 + $0x1d0] sm:$0xf] }
  0xfa   :  { %2144 = vmatpush.bf16.msrb.mxu1 %v3269_v36  ;;  %v3146_v36 = vld [vmem:[%s4408_s3 + $0x8] sm:$0xf0]  ;;  %v3309_v10 = vor.u32 %v3698_v7, %v3306_v8  ;;  %v3717_v28 = vld [vmem:[%s4408_s3 + $0x1d4] sm:$0xf0] }
  0xfb   :  { %2087 = vmatmul.bf16.vlgmr.msra.gmra.mxu3 %v4132_v42  ;;  %2109 = vmatpush.bf16.msra.mxu2 %v3297_v35  ;;  %v3377_v35 = vor.u32 %v3717_v28, %v3376_v27  ;;  %v3708_v28 = vld [vmem:[%s4408_s3 + $0x194] sm:$0xf] }
  0xfc   :  { %2131 = vmatpush.bf16.msrb.mxu3 %v3205_v29 }
  0xfe   :  { %2145 = vmatpush.bf16.msrb.mxu1 %v3261_v45  ;;  %v1469_v20 = vpop.f32.mrf.mxu3  ;;  %v1445_v24 = vpop.f32.mrf.mxu0  ;;  %v3149_v45 = vor.u32 %v3658_v33, %v3146_v36  ;;  %v3285_v33 = vor.u32 %v3692_v25, %v3282_v26  ;;  %v3690_v36 = vld [vmem:[%s4408_s3 + $0x104] sm:$0xf]  ;;  %v3354_v25 = vld [vmem:[%s4408_s3 + $0x1a8] sm:$0xf0]  ;;  %v304_v26 = vperm.slane %v3998_v54, 3 }
  0xff   :  { %v1470_v29 = vadd.f32 %v1469_v20, %v1457_v16  ;;  %v1458_v18 = vpop.f32.mrf.mxu1  ;;  %2110 = vmatpush.bf16.msra.mxu2 %v3289_v46  ;;  %v3301_v16 = vor.u32 %v3696_v13, %v3298_v14  ;;  %v3694_v20 = vld [vmem:[%s4408_s3 + $0x124] sm:$0xf]  ;;  %v3385_v24 = vor.u32 %v3719_v23, %v3384_v22  ;;  %v3362_v22 = vld [vmem:[%s4408_s3 + $0x1b8] sm:$0xf0] }
 0x100   :  { %2132 = vmatpush.bf16.msrb.mxu3 %v3197_v43  ;;  %v3674_v43 = vld [vmem:[%s4408_s3 + $0x84] sm:$0xf] }
 0x101   :  { %v3213_v60 = vor.u32 %v3674_v43, %v3210_v53  ;;  %v3368_v43 = vld [vmem:[%s4408_s3 + $0x1c0] sm:$0xf]  ;;  %v3715_v53 = vld [vmem:[%s4408_s3 + $0x1c4] sm:$0xf0] }
 0x102   :  { %2146 = vmatpush.bf16.msrb.mxu1 %v3253_v58  ;;  %v1482_v30 = vpop.f32.mrf.mxu2  ;;  %v3691_v58 = vld [vmem:[%s4408_s3 + $0x104] sm:$0xf0] }
 0x103   :  { %v1483_v44 = vadd.f32 %v1482_v30, %v1470_v29  ;;  %v3273_v61 = vor.u32 %v3691_v58, %v3272_v56  ;;  %v303_v29 = vperm.slane %v3998_v54, 2  ;;  %v3706_v54 = vld [vmem:[%s4408_s3 + $0x184] sm:$0xf] }
 0x104   :  { %2133 = vmatpush.bf16.msrb.mxu3 %v3189_v52  ;;  %v3281_v52 = vor.u32 %v3693_v31, %v3280_v49 }
 0x106   :  { %2147 = vmatpush.bf16.msrb.mxu1 %v3245_v3  ;;  %v1471_v47 = vpop.f32.mrf.mxu3  ;;  %v1495_v50 = vpop.f32.mrf.mxu0  ;;  %2111 = vmatpush.bf16.msra.mxu2 %v3281_v52  ;;  %v3700_v3 = vld [vmem:[%s4408_s3 + $0x154] sm:$0xf] }
 0x107   :  { %v1496_v34 = vadd.f32 %v1495_v50, %v1483_v44  ;;  %v3317_v5 = vor.u32 %v3700_v3, %v3314_v4  ;;  %v3713_v47 = vld [vmem:[%s4408_s3 + $0x1b4] sm:$0xf0] }
 0x108   :  { %2134 = vmatpush.bf16.msrb.mxu3 %v3181_v1  ;;  %v3702_v1 = vld [vmem:[%s4408_s3 + $0x164] sm:$0xf] }
 0x109   :  { %v1682_v55 = vmax.f32 %v1496_v34, 0.0  ;;  %v3352_v34 = vld [vmem:[%s4408_s3 + $0x1a0] sm:$0xf] }
 0x10a   :  { %2148 = vmatpush.bf16.msrb.mxu1 %v3237_v12  ;;  %v1484_v51 = vpop.f32.mrf.mxu2  ;;  %2112 = vmatpush.bf16.msra.mxu2 %v3273_v61  ;;  %v3709_v61 = vld [vmem:[%s4408_s3 + $0x194] sm:$0xf0] }
 0x10b   :  { %v1686_v59 = vpack.c.bf16 %v1682_v55, %v1682_v55  ;;  %v3711_v51 = vld [vmem:[%s4408_s3 + $0x1a4] sm:$0xf0] }
 0x10c   :  { %2135 = vmatpush.bf16.msrb.mxu3 %v3173_v9  ;;  %v3353_v55 = vor.u32 %v3711_v51, %v3352_v34 }
 0x10d   :  { %2100 = vmatmul.bf16.vlgmr.msra.gmra.mxu1 %v1686_v59 }
 0x10e   :  { %2149 = vmatpush.bf16.msrb.mxu1 %v3229_v21  ;;  %v1497_v6 = vpop.f32.mrf.mxu0  ;;  %2157 = vmatpush.bf16.msrb.mxu2 %v3333_v0  ;;  %v3290_v21 = vld [vmem:[%s4408_s3 + $0x128] sm:$0xf0] }
 0x10f   :  { %v3293_v48 = vor.u32 %v3694_v20, %v3290_v21  ;;  %v3712_v21 = vld [vmem:[%s4408_s3 + $0x1b4] sm:$0xf] }
 0x110   :  { %2136 = vmatpush.bf16.msrb.mxu3 %v3165_v57  ;;  %v3392_v57 = vld [vmem:[%s4408_s3 + $0x1f0] sm:$0xf]  ;;  %v3365_v23 = vor.u32 %v3712_v21, %v3362_v22 }
 0x111   :  { %v3393_v19 = vor.u32 %v3721_v17, %v3392_v57  ;;  %v3714_v17 = vld [vmem:[%s4408_s3 + $0x1c4] sm:$0xf]  ;;  %v3731_v21 = vld [vmem:[#allocation7 + $0x48] sm:$0xff] }
 0x112   :  { %2150 = vmatpush.bf16.msrb.mxu1 %v3221_v37  ;;  %v3274_v37 = vld [vmem:[%s4408_s3 + $0x108] sm:$0xf0] }
 0x113   :  { %2118 = vmatpush.bf16.msra.mxu0 %v3393_v19  ;;  %v3277_v18 = vor.u32 %v3690_v36, %v3274_v37  ;;  %v3370_v19 = vld [vmem:[%s4408_s3 + $0x1c8] sm:$0xf0] }
 0x114   :  { %2137 = vmatpush.bf16.msrb.mxu3 %v3157_v32  ;;  %v3373_v20 = vor.u32 %v3714_v17, %v3370_v19  ;;  %v3733_v17 = vld [vmem:[#allocation7 + $0x58] sm:$0xff] }
 0x116   :  { %2151 = vmatpush.bf16.msrb.mxu1 %v3213_v60  ;;  %v1508_v39 = vpop.f32.mrf.mxu1  ;;  %v3360_v60 = vld [vmem:[%s4408_s3 + $0x1b0] sm:$0xf] }
 0x117   :  { %2119 = vmatpush.bf16.msra.mxu0 %v3385_v24  ;;  %v1509_v40 = vadd.f32 %v1508_v39, %v303_v29  ;;  %v3361_v50 = vor.u32 %v3713_v47, %v3360_v60  ;;  %v3710_v24 = vld [vmem:[%s4408_s3 + $0x1a4] sm:$0xf]  ;;  %v3346_v29 = vld [vmem:[%s4408_s3 + $0x198] sm:$0xf0] }
 0x118   :  { %2138 = vmatpush.bf16.msrb.mxu3 %v3149_v45  ;;  %v3369_v45 = vor.u32 %v3715_v53, %v3368_v43  ;;  %v3357_v27 = vor.u32 %v3710_v24, %v3354_v25 }
 0x11a   :  { %v1534_v41 = vpop.f32.mrf.mxu0 }
 0x11b   :  { %2139 = vmatmul.bf16.vlgmr.msrb.gmra.mxu3 %v4132_v42  ;;  %v3322_v42 = vld [vmem:[%s4408_s3 + $0x168] sm:$0xf0]  ;;  %2120 = vmatpush.bf16.msra.mxu0 %v3377_v35 }
 0x11c   :  { %v3325_v2 = vor.u32 %v3702_v1, %v3322_v42  ;;  %v3336_v42 = vld [vmem:[%s4408_s3 + $0x180] sm:$0xf] }
 0x11d   :  { %2152 = vmatmul.bf16.vlgmr.msrb.gmra.mxu1 %v1686_v59  ;;  %v3344_v59 = vld [vmem:[%s4408_s3 + $0x190] sm:$0xf] }
 0x11e   :  { %2158 = vmatpush.bf16.msrb.mxu2 %v3325_v2  ;;  %v1510_v9 = vpop.f32.mrf.mxu1  ;;  %v1521_v12 = vpop.f32.mrf.mxu3  ;;  %v3345_v63 = vor.u32 %v3709_v61, %v3344_v59  ;;  %v3707_v2 = vld [vmem:[%s4408_s3 + $0x184] sm:$0xf0] }
 0x11f   :  { %v1522_v44 = vadd.f32 %v1521_v12, %v1509_v40  ;;  %2121 = vmatpush.bf16.msra.mxu0 %v3369_v45  ;;  %v3337_v3 = vor.u32 %v3707_v2, %v3336_v42  ;;  %v3718_v9 = vld [vmem:[%s4408_s3 + $0x1e4] sm:$0xf] }
 0x121   :  { %v1535_v49 = vadd.f32 %v1534_v41, %v1522_v44  ;;  %v3720_v41 = vld [vmem:[%s4408_s3 + $0x1f4] sm:$0xf] }
 0x122   :  { %2159 = vmatpush.bf16.msrb.mxu2 %v3317_v5  ;;  %v1547_v11 = vpop.f32.mrf.mxu2  ;;  %v1536_v15 = vpop.f32.mrf.mxu0  ;;  %v3394_v5 = vld [vmem:[%s4408_s3 + $0x1f8] sm:$0xf0] }
 0x123   :  { %2122 = vmatpush.bf16.msra.mxu0 %v3361_v50  ;;  %v1548_v52 = vadd.f32 %v1547_v11, %v1535_v49  ;;  %v3397_v7 = vor.u32 %v3720_v41, %v3394_v5  ;;  %v3716_v15 = vld [vmem:[%s4408_s3 + $0x1d4] sm:$0xf] }
 0x124   :  { %v3728_v41 = vld [vmem:[#allocation7 + $0x30] sm:$0xff]  ;;  %v3727_v5 = vld [vmem:[#allocation7 + $0x28] sm:$0xff] }
 0x126   :  { %2160 = vmatpush.bf16.msrb.mxu2 %v3309_v10  ;;  %v1523_v32 = vpop.f32.mrf.mxu3  ;;  %v3386_v10 = vld [vmem:[%s4408_s3 + $0x1e8] sm:$0xf0] }
 0x127   :  { %2123 = vmatpush.bf16.msra.mxu0 %v3353_v55  ;;  %v3389_v12 = vor.u32 %v3718_v9, %v3386_v10  ;;  %v3736_v9 = vld [vmem:[#allocation7 + $0x70] sm:$0xff]  ;;  %v3725_v10 = vld [vmem:[#allocation7 + $0x18] sm:$0xff] }
 0x12a   :  { %2161 = vmatpush.bf16.msrb.mxu2 %v3301_v16  ;;  %v1549_v30 = vpop.f32.mrf.mxu2  ;;  %v1586_v38 = vpop.f32.mrf.mxu0  ;;  %v3378_v16 = vld [vmem:[%s4408_s3 + $0x1d8] sm:$0xf0] }
 0x12b   :  { %2124 = vmatpush.bf16.msra.mxu0 %v3345_v63  ;;  %v3381_v57 = vor.u32 %v3716_v15, %v3378_v16  ;;  %v3349_v30 = vor.u32 %v3708_v28, %v3346_v29  ;;  %v3722_v16 = vld [vmem:[#allocation7] sm:$0xff] }
 0x12e   :  { %2162 = vmatpush.bf16.msrb.mxu2 %v3293_v48 }
 0x12f   :  { %2125 = vmatpush.bf16.msra.mxu0 %v3337_v3 }
 0x132   :  { %2163 = vmatpush.bf16.msrb.mxu2 %v3285_v33  ;;  %v1588_v46 = vpop.f32.mrf.mxu0 }
 0x133   :  { %2170 = vmatpush.bf16.msrb.mxu0 %v3397_v7  ;;  %v3726_v7 = vld [vmem:[#allocation7 + $0x20] sm:$0xff] }
 0x136   :  { %2164 = vmatpush.bf16.msrb.mxu2 %v3277_v18  ;;  %v1560_v31 = vpop.f32.mrf.mxu1 }
 0x137   :  { %v1561_v56 = vadd.f32 %v1560_v31, %v1548_v52  ;;  %2171 = vmatpush.bf16.msrb.mxu0 %v3389_v12  ;;  %v3724_v12 = vld [vmem:[#allocation7 + $0x10] sm:$0xff] }
 0x13b   :  { %2172 = vmatpush.bf16.msrb.mxu0 %v3381_v57  ;;  %v3734_v57 = vld [vmem:[#allocation7 + $0x60] sm:$0xff] }
 0x13e   :  { %v1573_v58 = vpop.f32.mrf.mxu3  ;;  %v1562_v62 = vpop.f32.mrf.mxu1 }
 0x13f   :  { %v1574_v6 = vadd.f32 %v1573_v58, %v1561_v56  ;;  %v1612_v1 = vpop.f32.mrf.mxu0  ;;  %2173 = vmatpush.bf16.msrb.mxu0 %v3373_v20  ;;  %v1753_v56 = vld [vmem:[#allocation6] sm:$0x3]  ;;  %v3732_v20 = vld [vmem:[#allocation7 + $0x50] sm:$0xff] }
 0x140   :  { %v1755_v58 = vperm.slane %v1753_v56, 0 }
 0x141   :  { %v1587_v39 = vadd.f32 %v1586_v38, %v1574_v6  ;;  %v3338_v38 = vld [vmem:[%s4408_s3 + $0x188] sm:$0xf0] }
 0x142   :  { %v1599_v0 = vpop.f32.mrf.mxu2  ;;  %v3341_v18 = vor.u32 %v3706_v54, %v3338_v38  ;;  %v3747_v54 = vld [vmem:[#allocation9] ss:$0 sm:$0xff] }
 0x143   :  { %v1683_v4 = vmax.f32 %v1587_v39, 0.0  ;;  %2174 = vmatpush.bf16.msrb.mxu0 %v3365_v23  ;;  %v1600_v33 = vadd.f32 %v1599_v0, %v304_v26  ;;  %v1756_v0 = vperm.slane %v1753_v56, 1 }
 0x145   :  { %v1687_v8 = vpack.c.bf16 %v1683_v4, %v1683_v4  ;;  %v1613_v40 = vadd.f32 %v1612_v1, %v1600_v33  ;;  %v3729_v4 = vld [vmem:[#allocation7 + $0x38] sm:$0xff] }
 0x146   :  { %v1575_v11 = vpop.f32.mrf.mxu3  ;;  %2319 = vmatpush.bf16.msra.mxu3 %v3729_v4 }
 0x147   :  { %2113 = vmatmul.bf16.vlgmr.msra.gmra.mxu2 %v1687_v8  ;;  %v1614_v14 = vpop.f32.mrf.mxu0  ;;  %2175 = vmatpush.bf16.msrb.mxu0 %v3357_v27 }
 0x148   :  { %v3735_v14 = vld [vmem:[#allocation7 + $0x68] sm:$0xff] }
 0x14a   :  { %v1601_v13 = vpop.f32.mrf.mxu2  ;;  %2320 = vmatpush.bf16.msra.mxu3 %v3728_v41 }
 0x14b   :  { %2176 = vmatpush.bf16.msrb.mxu0 %v3349_v30  ;;  %v3723_v13 = vld [vmem:[#allocation7 + $0x8] sm:$0xff] }
 0x14e   :  { %2321 = vmatpush.bf16.msra.mxu3 %v3727_v5 }
 0x14f   :  { %2177 = vmatpush.bf16.msrb.mxu0 %v3341_v18 }
 0x152   :  { %2322 = vmatpush.bf16.msra.mxu3 %v3726_v7 }
 0x156   :  { %v1625_v48 = vpop.f32.mrf.mxu1  ;;  %2323 = vmatpush.bf16.msra.mxu3 %v3725_v10 }
 0x157   :  { %2165 = vmatmul.bf16.vlgmr.msrb.gmra.mxu2 %v1687_v8  ;;  %v1626_v43 = vadd.f32 %v1625_v48, %v1613_v40  ;;  %v3737_v8 = vld [vmem:[#allocation7 + $0x78] sm:$0xff]  ;;  %v3730_v48 = vld [vmem:[#allocation7 + $0x40] sm:$0xff] }
 0x158   :  { %2332 = vmatpush.bf16.msra.mxu1 %v3737_v8 }
 0x15a   :  { %2324 = vmatpush.bf16.msra.mxu3 %v3724_v12 }
 0x15c   :  { %2333 = vmatpush.bf16.msra.mxu1 %v3736_v9 }
 0x15e   :  { %v1638_v32 = vpop.f32.mrf.mxu3  ;;  %v1627_v35 = vpop.f32.mrf.mxu1  ;;  %2325 = vmatpush.bf16.msra.mxu3 %v3723_v13 }
 0x15f   :  { %v1664_v37 = vpop.f32.mrf.mxu0  ;;  %v1639_v44 = vadd.f32 %v1638_v32, %v1626_v43 }
 0x160   :  { %2334 = vmatpush.bf16.msra.mxu1 %v3735_v14 }
 0x162   :  { %v1651_v36 = vpop.f32.mrf.mxu2  ;;  %2326 = vmatpush.bf16.msra.mxu3 %v3722_v16 }
 0x163   :  { %v1652_v60 = vadd.f32 %v1651_v36, %v1639_v44 }
 0x164   :  { %2335 = vmatpush.bf16.msra.mxu1 %v3734_v57 }
 0x165   :  { %v1665_v47 = vadd.f32 %v1664_v37, %v1652_v60 }
 0x166   :  { %v1640_v53 = vpop.f32.mrf.mxu3 }
 0x167   :  { %v1666_v46 = vpop.f32.mrf.mxu0 }
 0x168   :  { %2336 = vmatpush.bf16.msra.mxu1 %v3733_v17 }
 0x16a   :  { %v1653_v45 = vpop.f32.mrf.mxu2 }
 0x16c   :  { %2337 = vmatpush.bf16.msra.mxu1 %v3732_v20 }
 0x170   :  { %2338 = vmatpush.bf16.msra.mxu1 %v3731_v21 }
 0x172   :  { %v1677_v49 = vpop.f32.mrf.mxu2 }
 0x173   :  { %v1678_v31 = vadd.f32 %v1677_v49, %v1665_v47 }
 0x174   :  { %2339 = vmatpush.bf16.msra.mxu1 %v3730_v48 }
 0x175   :  { %v1684_v50 = vmax.f32 %v1678_v31, 0.0 }
 0x177   :  { %v1688_v34 = vpack.c.bf16 %v1684_v50, %v1684_v50 }
 0x179   :  { %2126 = vmatmul.bf16.vlgmr.msra.gmra.mxu0 %v1688_v34 }
 0x17a   :  { %v1679_v51 = vpop.f32.mrf.mxu2 }
 0x17e   :  { %v2088_v52 = vpop.f32.mrf.mxu3 }
 0x17f   :  { %v2089_v59 = vadd.f32 %v2088_v52, %v1755_v58 }
 0x186   :  { %v2090_v55 = vpop.f32.mrf.mxu3 }
 0x189   :  { %2178 = vmatmul.bf16.vlgmr.msrb.gmra.mxu0 %v1688_v34 }
 0x18a   :  { %v2101_v61 = vpop.f32.mrf.mxu1 }
 0x18b   :  { %v2102_v6 = vadd.f32 %v2101_v61, %v2089_v59 }
 0x192   :  { %v2103_v63 = vpop.f32.mrf.mxu1 }
 0x19a   :  { %v2153_v2 = vpop.f32.mrf.mxu1 }
 0x19e   :  { %v2140_v62 = vpop.f32.mrf.mxu3 }
 0x19f   :  { %v2141_v42 = vadd.f32 %v2140_v62, %v1756_v0 }
 0x1a1   :  { %v2154_v39 = vadd.f32 %v2153_v2, %v2141_v42 }
 0x1a2   :  { %v2155_v3 = vpop.f32.mrf.mxu1 }
 0x1a6   :  { %v2142_v1 = vpop.f32.mrf.mxu3 }
 0x1ca   :  { %v2114_v11 = vpop.f32.mrf.mxu2 }
 0x1cb   :  { %v2115_v23 = vadd.f32 %v2114_v11, %v2102_v6 }
 0x1d2   :  { %v2116_v15 = vpop.f32.mrf.mxu2 }
 0x1da   :  { %v2166_v19 = vpop.f32.mrf.mxu2 }
 0x1db   :  { %v2167_v29 = vadd.f32 %v2166_v19, %v2154_v39 }
 0x1e2   :  { %v2168_v22 = vpop.f32.mrf.mxu2 }
 0x1f6   :  { %v2127_v24 = vpop.f32.mrf.mxu0 }
 0x1f7   :  { %v2128_v25 = vadd.f32 %v2127_v24, %v2115_v23 }
 0x1f9   :  { %v2183_v26 = vmax.f32 %v2128_v25, 0.0 }
 0x1fb   :  { %v2185_v27 = vpack.c.bf16 %v2183_v26, %v2183_v26 }
 0x1fd   :  { %2327 = vmatmul.bf16.vlgmr.msra.gmra.mxu3 %v2185_v27 }
 0x1fe   :  { %v2129_v28 = vpop.f32.mrf.mxu0 }
 0x206   :  { %v2179_v30 = vpop.f32.mrf.mxu0 }
 0x207   :  { %v2180_v32 = vadd.f32 %v2179_v30, %v2167_v29 }
 0x209   :  { %v2184_v33 = vmax.f32 %v2180_v32, 0.0 }
 0x20b   :  { %v2186_v35 = vpack.c.bf16 %v2184_v33, %v2184_v33 }
 0x20d   :  { %2340 = vmatmul.bf16.vlgmr.msra.gmra.mxu1 %v2186_v35 }
 0x20e   :  { %v2181_v36 = vpop.f32.mrf.mxu0 }
 0x280   :  { %v2328_v37 = vpop.f32.mrf.mxu3 }
 0x281   :  { %v2329_v40 = vadd.f32 %v3747_v54, %v2328_v37 }
 0x288   :  { %v2330_v38 = vpop.f32.mrf.mxu3 }
 0x28a   :  { %v2341_v18 = vpop.f32.mrf.mxu1 }
 0x28b   :  { %v2342_v43 = vadd.f32 %v2341_v18, %v2329_v40 }
 0x28d   :  { %v2345_v53 = vpack.c.bf16 %v2342_v43, %v2342_v43 }
 0x28f   :  { %2346 = vst [vmem:[%s4412_s7] sm:$0xf] %v2345_v53 }
 0x292   :  { %v2343_v44 = vpop.f32.mrf.mxu1 }
 0x293   :  { %2351 = vsyncpa [#allocation3], 1 }
 0x294   :  { %2352 = vsyncpa [#allocation5], 1 }
 0x295   :  { %2353 = vsyncpa [#allocation8], 1 }

</bundles_post_ra>
